<compile_context>
chip_gen: v5e
topology: v5e:2x2
jax: 0.10.0
libtpu: 0.0.40
codegen_flags: <defaults>
</compile_context>

<pallas_src>
import functools
import math

import jax
import jax.numpy as jnp
from jax.experimental import pallas as pl
from jax.experimental.pallas import tpu as pltpu


# ----------------------------------------------------------------------------
# Kernel
# ----------------------------------------------------------------------------
def _decoder_attn_kernel(last_ref, embp_ref, bias_ref, kblk_ref, rm_ref,
                         invrc_ref, lc_ref, mask_ref, out_ref,
                         *, n_heads, tanh_clipping, n_valid):
    Bb, G, _ = last_ref.shape
    N_pad = rm_ref.shape[-1]
    H = embp_ref.shape[-1]
    f32 = jnp.float32
    inv_sqrt_h = jnp.float32(1.0 / math.sqrt(H))
    inv_nh = jnp.float32(1.0 / n_heads)
    inv_n = jnp.float32(1.0 / n_valid)

    # ---- batched gather + collapsed projection: fq = one_hot @ emb_proj + b ----
    # Batch-block one-hot: row (b,g) selects row (b*N_pad + last[b,g]) of the
    # flattened [Bb*N_pad, H] projected-embedding table.  M = Bb*G >= 8 fills
    # the sublanes; contraction K = Bb*N_pad fills the MXU.
    last = last_ref[...]                                                  # [Bb,G,1] i32
    b_off = jax.lax.broadcasted_iota(jnp.int32, (Bb, G, 1), 0) * N_pad
    flat_idx = last + b_off                                               # [Bb,G,1]
    col_iota = jax.lax.broadcasted_iota(jnp.int32, (Bb, G, Bb * N_pad), 2)
    one_hot = (col_iota == flat_idx).astype(f32).reshape(Bb * G, Bb * N_pad)
    emb_flat = embp_ref[...].reshape(Bb * N_pad, H)
    lne_proj = jnp.dot(one_hot, emb_flat, preferred_element_type=f32)     # [Bb*G,H]
    fq = lne_proj.reshape(Bb, G, H) + bias_ref[...]                       # [Bb,G,H]

    # TODO(synk): mask_visited in the PyTorch forward is computed but never used
    # (dead code); it is intentionally not reproduced here.
    # NOTE: q_first semantics correspond to the first decode step (q_first built
    # from the same last-node embedding), matching the single-call test below.

    for b in range(Bb):                                   # static unroll, Bb small
        lc = lc_ref[b]                                    # [G, N_pad]
        mask = mask_ref[b]                                # [G, N_pad]

        # IoU penalty.  Union reciprocal is precomputed (rowcount path); the
        # lc!=0 branch of the union is exactly n_valid, so no divides here.
        inter = jnp.dot(lc, rm_ref[b], preferred_element_type=f32)        # [G,N_pad]
        inv_union = jnp.where(lc != 0.0, inv_n, invrc_ref[b])             # [G,N_pad]
        iou = inter * inv_union

        # ninf mask -> large finite additive mask (matches torch forward);
        # padded lanes arrive as -inf and therefore get -1e8.
        mask_prob = jnp.where(mask == -jnp.inf, jnp.float32(-1e8),
                              jnp.where(mask == jnp.inf, jnp.float32(1e8), mask))

        # One block-diagonal matmul produces all heads' scores at once.
        scores_all = jnp.dot(fq[b], kblk_ref[b],
                             preferred_element_type=f32)                  # [G, nh*N_pad]

        probs_acc = jnp.zeros((G, N_pad), f32)
        for h in range(n_heads):                          # lane-aligned slices
            s = scores_all[:, h * N_pad:(h + 1) * N_pad] * inv_sqrt_h - iou
            s = tanh_clipping * jnp.tanh(s) + mask_prob
            m = jnp.max(s, axis=-1, keepdims=True)
            e = jnp.exp(s - m)
            denom = jnp.sum(e, axis=-1, keepdims=True)                    # [G,1]
            probs_acc = probs_acc + e * pl.reciprocal(denom, approx=True)

        out_ref[b] = (probs_acc * inv_nh).astype(out_ref.dtype)


# ----------------------------------------------------------------------------
# reset(): per-episode precompute (plain JAX setup glue)
# ----------------------------------------------------------------------------
def decoder_reset(range_matrix, embeddings, wq_graph, wq_first, wq_last, wq, wk,
                  *, n_heads, n_pad_to=128):
    B, N, H = embeddings.shape
    dh = H // n_heads
    assert dh * n_heads == H
    N_pad = pl.cdiv(N, n_pad_to) * n_pad_to

    graph_embedding = jnp.mean(embeddings, axis=1, keepdims=True)          # [B,1,H]
    q_graph = graph_embedding @ wq_graph                                   # [B,1,H]
    bias = q_graph @ wq                                                    # [B,1,H]

    # Collapsed projection: (Wq_last + Wq_first) @ Wq applied to the embeddings
    # table once (gather commutes with the row-wise projection).
    w_eff = (wq_last + wq_first) @ wq                                      # [H,H]
    emb_proj = embeddings @ w_eff                                          # [B,N,H]
    emb_proj = jnp.pad(emb_proj, ((0, 0), (0, N_pad - N), (0, 0)))         # [B,N_pad,H]

    # Block-diagonal per-head keys: head h occupies rows h*dh:(h+1)*dh and
    # columns h*N_pad : h*N_pad+N.  Zero columns (padding) are masked to -inf
    # downstream so they carry no probability mass.
    k = embeddings @ wk                                                    # [B,N,H]
    logit_k = k.reshape(B, N, n_heads, dh).transpose(0, 2, 3, 1)           # [B,nh,dh,N]
    k_block = jnp.zeros((B, H, n_heads * N_pad), jnp.float32)
    for h in range(n_heads):
        k_block = k_block.at[:, h * dh:(h + 1) * dh,
                             h * N_pad:h * N_pad + N].set(logit_k[:, h])

    rm_pad = jnp.pad(range_matrix, ((0, 0), (0, N_pad - N), (0, N_pad - N)))

    # Per-row nonzero count of range_matrix -> clamped reciprocal (the lc==0
    # branch of the union); clamp avoids divide-by-zero on padded/empty rows.
    rowcount = jnp.sum((range_matrix != 0.0).astype(jnp.float32), axis=-1)  # [B,N]
    inv_rc = 1.0 / jnp.maximum(rowcount, 1.0)
    inv_rc = jnp.pad(inv_rc, ((0, 0), (0, N_pad - N)),
                     constant_values=1.0)[:, None, :]                       # [B,1,N_pad]

    return dict(emb_proj=emb_proj, bias=bias, k_block=k_block,
                rm_pad=rm_pad, inv_rc=inv_rc, N=N, N_pad=N_pad, H=H)


def _pick_block_batch(B, G):
    """Smallest divisor of B with Bb*G >= 8 sublanes (capped to keep tiles small)."""
    best = 1
    for bb in range(1, B + 1):
        if B % bb == 0 and bb * G <= 64:
            best = bb
            if bb * G >= 8:
                break
    return best


# ----------------------------------------------------------------------------
# forward(): per-decode-step fused kernel call
# ----------------------------------------------------------------------------
def decoder_attention_forward(last_node, group_ninf_mask, last_coverd, state,
                              *, n_heads, tanh_clipping, block_batch=None):
    emb_proj, bias, k_block = state["emb_proj"], state["bias"], state["k_block"]
    rm_pad, inv_rc = state["rm_pad"], state["inv_rc"]
    N, N_pad, H = state["N"], state["N_pad"], state["H"]
    B = emb_proj.shape[0]
    G = group_ninf_mask.shape[1]
    HN = n_heads * N_pad

    Bb = _pick_block_batch(B, G) if block_batch is None else block_batch
    assert B % Bb == 0

    pad = N_pad - N
    lc_pad = jnp.pad(last_coverd.astype(jnp.float32), ((0, 0), (0, 0), (0, pad)))
    mask_pad = jnp.pad(group_ninf_mask.astype(jnp.float32),
                       ((0, 0), (0, 0), (0, pad)), constant_values=-jnp.inf)
    last_col = last_node.astype(jnp.int32).reshape(B, G, 1)

    kernel = functools.partial(_decoder_attn_kernel, n_heads=n_heads,
                               tanh_clipping=tanh_clipping, n_valid=N)

    # NOTE: at production N (hundreds+), set vmem_limit_bytes explicitly and
    # tile rm_pad along its second node axis (v7x has 64 MiB VMEM, v5e a
    # ~16 MiB scoped default).  At these toy shapes the defaults are ample.
    probs_pad = pl.pallas_call(
        kernel,
        out_shape=jax.ShapeDtypeStruct((B, G, N_pad), jnp.float32),
        grid=(B // Bb,),
        in_specs=[
            pl.BlockSpec((Bb, G, 1), lambda i: (i, 0, 0)),            # last_node idx
            pl.BlockSpec((Bb, N_pad, H), lambda i: (i, 0, 0)),        # emb @ W_eff
            pl.BlockSpec((Bb, 1, H), lambda i: (i, 0, 0)),            # q_graph @ Wq
            pl.BlockSpec((Bb, H, HN), lambda i: (i, 0, 0)),           # block-diag keys
            pl.BlockSpec((Bb, N_pad, N_pad), lambda i: (i, 0, 0)),    # range_matrix
            pl.BlockSpec((Bb, 1, N_pad), lambda i: (i, 0, 0)),        # 1/rowcount
            pl.BlockSpec((Bb, G, N_pad), lambda i: (i, 0, 0)),        # last_coverd
            pl.BlockSpec((Bb, G, N_pad), lambda i: (i, 0, 0)),        # ninf mask
        ],
        out_specs=pl.BlockSpec((Bb, G, N_pad), lambda i: (i, 0, 0)),
        compiler_params=pltpu.CompilerParams(
            dimension_semantics=("parallel",)),
    )(last_col, emb_proj, bias, k_block, rm_pad, inv_rc, lc_pad, mask_pad)

    return probs_pad[:, :, :N]


# ----------------------------------------------------------------------------
# Pure-JAX mirror of the PyTorch reset()+forward() (default config), for checks
# ----------------------------------------------------------------------------
def reference_forward(last_node, group_ninf_mask, last_coverd, embeddings,
                      range_matrix, wq_graph, wq_first, wq_last, wq, wk,
                      *, n_heads, tanh_clipping):
    B, N, H = embeddings.shape
    dh = H // n_heads
    graph_embedding = jnp.mean(embeddings, axis=1, keepdims=True)
    q_graph = graph_embedding @ wq_graph
    k = embeddings @ wk
    logit_k = k.reshape(B, N, n_heads, dh).transpose(0, 2, 3, 1)            # [B,nh,dh,N]

    lne = embeddings[jnp.arange(B)[:, None], last_node]                     # [B,G,H]
    q_last = lne @ wq_last
    q_first = lne @ wq_first
    final_q = q_last + q_first + q_graph
    inter = jnp.einsum('bgi,bij->bgj', last_coverd, range_matrix)
    union = jnp.sum(jnp.logical_or(last_coverd[..., None],
                                   range_matrix[:, None, :, :]),
                    axis=-1).astype(jnp.float32)
    iou = inter / union
    fq = (final_q @ wq).reshape(B, -1, n_heads, dh).transpose(0, 2, 1, 3)
    score = jnp.einsum('bhgd,bhdn->bhgn', fq, logit_k) / math.sqrt(H) - iou[:, None]
    score_clipped = tanh_clipping * jnp.tanh(score)
    mask_prob = jnp.where(jnp.isneginf(group_ninf_mask), -1e8,
                          jnp.where(jnp.isposinf(group_ninf_mask), 1e8,
                                    group_ninf_mask))
    probs = jax.nn.softmax(score_clipped + mask_prob[:, None], axis=-1).mean(axis=1)
    return probs


if __name__ == "__main__":
    B, N, H, G = 2, 20, 32, 4            # batch, nodes, embedding_dim, group size
    n_heads = 8
    tanh_clipping = 50.0

    key = jax.random.PRNGKey(0)
    keys = jax.random.split(key, 10)

    embeddings = jax.random.normal(keys[0], (B, N, H), jnp.float32)
    rnd_cov = (jax.random.uniform(keys[1], (B, N, N)) < 0.3).astype(jnp.float32)
    eye = jnp.broadcast_to(jnp.eye(N, dtype=jnp.float32), (B, N, N))
    range_matrix = jnp.maximum(rnd_cov, eye)      # every node covers itself

    last_coverd = (jax.random.uniform(keys[2], (B, G, N)) < 0.3).astype(jnp.float32)
    mask_bool = jax.random.uniform(keys[3], (B, G, N)) < 0.25
    group_ninf_mask = jnp.where(mask_bool, -jnp.inf, 0.0).astype(jnp.float32)
    last_node = jax.random.randint(keys[4], (B, G), 0, N, jnp.int32)

    scale = 1.0 / math.sqrt(H)
    wq_graph = jax.random.normal(keys[5], (H, H), jnp.float32) * scale
    wq_first = jax.random.normal(keys[6], (H, H), jnp.float32) * scale
    wq_last = jax.random.normal(keys[7], (H, H), jnp.float32) * scale
    wq = jax.random.normal(keys[8], (H, H), jnp.float32) * scale
    wk = jax.random.normal(keys[9], (H, H), jnp.float32) * scale

    # reset(): per-episode precompute (collapsed projection, block-diag keys,
    # rowcount reciprocal, padded range matrix).
    state = decoder_reset(range_matrix, embeddings, wq_graph, wq_first,
                          wq_last, wq, wk, n_heads=n_heads)

    probs = decoder_attention_forward(
        last_node, group_ninf_mask, last_coverd, state,
        n_heads=n_heads, tanh_clipping=tanh_clipping)
    jax.block_until_ready(probs)

    ref = reference_forward(
        last_node, group_ninf_mask, last_coverd, embeddings, range_matrix,
        wq_graph, wq_first, wq_last, wq, wk,
        n_heads=n_heads, tanh_clipping=tanh_clipping)

    assert probs.shape == (B, G, N)
    assert bool(jnp.all(jnp.isfinite(probs)))
    # approx reciprocal is used for the softmax denominator -> slightly looser tol
    assert bool(jnp.allclose(probs.sum(-1), 1.0, atol=5e-3))
    assert bool(jnp.allclose(probs, ref, atol=2e-3, rtol=2e-3))
    print("KERNEL_OK")
</pallas_src>

<mosaic_0001>
module attributes {stable_mosaic.version = 11 : i64} {
  func.func @_decoder_attn_kernel(%arg0: i32, %arg1: memref<2x4x1xi32, #tpu.memory_space<vmem>>, %arg2: memref<2x128x32xf32, #tpu.memory_space<vmem>>, %arg3: memref<2x1x32xf32, #tpu.memory_space<vmem>>, %arg4: memref<2x32x1024xf32, #tpu.memory_space<vmem>>, %arg5: memref<2x128x128xf32, #tpu.memory_space<vmem>>, %arg6: memref<2x1x128xf32, #tpu.memory_space<vmem>>, %arg7: memref<2x4x128xf32, #tpu.memory_space<vmem>>, %arg8: memref<2x4x128xf32, #tpu.memory_space<vmem>>, %arg9: memref<2x4x128xf32, #tpu.memory_space<vmem>>) attributes {dimension_semantics = [#tpu.dimension_semantics<parallel>], iteration_bounds = array<i64: 1>, scalar_prefetch = 0 : i64, scratch_operands = 0 : i64, tpu.core_type = #tpu.core_type<tc>, window_params = [{transform_indices = @transform_0, window_bounds = array<i64: 2, 4, 1>}, {transform_indices = @transform_1, window_bounds = array<i64: 2, 128, 32>}, {transform_indices = @transform_2, window_bounds = array<i64: 2, 1, 32>}, {transform_indices = @transform_3, window_bounds = array<i64: 2, 32, 1024>}, {transform_indices = @transform_4, window_bounds = array<i64: 2, 128, 128>}, {transform_indices = @transform_5, window_bounds = array<i64: 2, 1, 128>}, {transform_indices = @transform_6, window_bounds = array<i64: 2, 4, 128>}, {transform_indices = @transform_7, window_bounds = array<i64: 2, 4, 128>}, {transform_indices = @transform_8, window_bounds = array<i64: 2, 4, 128>}]} {
    %c0 = arith.constant 0 : index
    %c0_0 = arith.constant 0 : index
    %c0_1 = arith.constant 0 : index
    %0 = vector.load %arg1[%c0, %c0_0, %c0_1] : memref<2x4x1xi32, #tpu.memory_space<vmem>>, vector<2x4x1xi32>
    %1 = tpu.iota {dimensions = array<i32: 0>} : vector<2x4x1xi32>
    %c128_i32 = arith.constant 128 : i32
    %2 = vector.broadcast %c128_i32 : i32 to vector<2x4x1xi32>
    %3 = arith.muli %1, %2 : vector<2x4x1xi32>
    %4 = arith.addi %0, %3 : vector<2x4x1xi32>
    %5 = tpu.iota {dimensions = array<i32: 2>} : vector<2x4x256xi32>
    %6 = vector.broadcast %4 : vector<2x4x1xi32> to vector<2x4x256xi32>
    %7 = arith.cmpi eq, %5, %6 : vector<2x4x256xi32>
    %8 = arith.extui %7 : vector<2x4x256xi1> to vector<2x4x256xi32>
    %9 = arith.sitofp %8 : vector<2x4x256xi32> to vector<2x4x256xf32>
    %10 = vector.shape_cast %9 : vector<2x4x256xf32> to vector<8x256xf32>
    %c0_2 = arith.constant 0 : index
    %c0_3 = arith.constant 0 : index
    %c0_4 = arith.constant 0 : index
    %11 = vector.load %arg2[%c0_2, %c0_3, %c0_4] : memref<2x128x32xf32, #tpu.memory_space<vmem>>, vector<2x128x32xf32>
    %12 = vector.shape_cast %11 : vector<2x128x32xf32> to vector<256x32xf32>
    %cst = arith.constant dense<0.000000e+00> : vector<8x32xf32>
    %13 = tpu.matmul %10, %12, %cst {dimension_numbers = #tpu.dot_dimension_numbers<[1], [0], [0], [1], [0, 0, 1, 1], [], []>} : vector<8x256xf32>, vector<256x32xf32>, vector<8x32xf32> -> vector<8x32xf32>
    %14 = vector.shape_cast %13 : vector<8x32xf32> to vector<2x4x32xf32>
    %c0_5 = arith.constant 0 : index
    %c0_6 = arith.constant 0 : index
    %c0_7 = arith.constant 0 : index
    %15 = vector.load %arg3[%c0_5, %c0_6, %c0_7] : memref<2x1x32xf32, #tpu.memory_space<vmem>>, vector<2x1x32xf32>
    %16 = vector.broadcast %15 : vector<2x1x32xf32> to vector<2x4x32xf32>
    %17 = arith.addf %14, %16 : vector<2x4x32xf32>
    %c0_8 = arith.constant 0 : index
    %c0_9 = arith.constant 0 : index
    %c0_10 = arith.constant 0 : index
    %18 = vector.load %arg7[%c0_8, %c0_9, %c0_10] : memref<2x4x128xf32, #tpu.memory_space<vmem>>, vector<1x4x128xf32>
    %19 = vector.shape_cast %18 : vector<1x4x128xf32> to vector<4x128xf32>
    %c0_11 = arith.constant 0 : index
    %c0_12 = arith.constant 0 : index
    %c0_13 = arith.constant 0 : index
    %20 = vector.load %arg8[%c0_11, %c0_12, %c0_13] : memref<2x4x128xf32, #tpu.memory_space<vmem>>, vector<1x4x128xf32>
    %21 = vector.shape_cast %20 : vector<1x4x128xf32> to vector<4x128xf32>
    %c0_14 = arith.constant 0 : index
    %c0_15 = arith.constant 0 : index
    %c0_16 = arith.constant 0 : index
    %22 = vector.load %arg5[%c0_14, %c0_15, %c0_16] : memref<2x128x128xf32, #tpu.memory_space<vmem>>, vector<1x128x128xf32>
    %23 = vector.shape_cast %22 : vector<1x128x128xf32> to vector<128x128xf32>
    %cst_17 = arith.constant dense<0.000000e+00> : vector<4x128xf32>
    %24 = tpu.matmul %19, %23, %cst_17 {dimension_numbers = #tpu.dot_dimension_numbers<[1], [0], [0], [1], [0, 0, 1, 1], [], []>} : vector<4x128xf32>, vector<128x128xf32>, vector<4x128xf32> -> vector<4x128xf32>
    %cst_18 = arith.constant 0.000000e+00 : f32
    %25 = vector.broadcast %cst_18 : f32 to vector<4x128xf32>
    %26 = arith.cmpf one, %19, %25 : vector<4x128xf32>
    %c0_19 = arith.constant 0 : index
    %c0_20 = arith.constant 0 : index
    %c0_21 = arith.constant 0 : index
    %27 = vector.load %arg6[%c0_19, %c0_20, %c0_21] : memref<2x1x128xf32, #tpu.memory_space<vmem>>, vector<1x1x128xf32>
    %28 = vector.shape_cast %27 : vector<1x1x128xf32> to vector<1x128xf32>
    %cst_22 = arith.constant 5.000000e-02 : f32
    %29 = vector.broadcast %cst_22 : f32 to vector<4x128xf32>
    %30 = vector.shape_cast %28 : vector<1x128xf32> to vector<1x128xf32>
    %31 = vector.broadcast %30 : vector<1x128xf32> to vector<4x128xf32>
    %32 = arith.select %26, %29, %31 : vector<4x128xi1>, vector<4x128xf32>
    %33 = arith.mulf %24, %32 : vector<4x128xf32>
    %cst_23 = arith.constant 0xFF800000 : f32
    %34 = vector.broadcast %cst_23 : f32 to vector<4x128xf32>
    %35 = arith.cmpf oeq, %21, %34 : vector<4x128xf32>
    %cst_24 = arith.constant 0x7F800000 : f32
    %36 = vector.broadcast %cst_24 : f32 to vector<4x128xf32>
    %37 = arith.cmpf oeq, %21, %36 : vector<4x128xf32>
    %cst_25 = arith.constant 1.000000e+08 : f32
    %38 = vector.broadcast %cst_25 : f32 to vector<4x128xf32>
    %39 = arith.select %37, %38, %21 : vector<4x128xi1>, vector<4x128xf32>
    %cst_26 = arith.constant -1.000000e+08 : f32
    %40 = vector.broadcast %cst_26 : f32 to vector<4x128xf32>
    %41 = arith.select %35, %40, %39 : vector<4x128xi1>, vector<4x128xf32>
    %42 = vector.extract_strided_slice %17 {offsets = [0, 0, 0], sizes = [1, 4, 32], strides = [1, 1, 1]} : vector<2x4x32xf32> to vector<1x4x32xf32>
    %43 = vector.shape_cast %42 : vector<1x4x32xf32> to vector<4x32xf32>
    %c0_27 = arith.constant 0 : index
    %c0_28 = arith.constant 0 : index
    %c0_29 = arith.constant 0 : index
    %44 = vector.load %arg4[%c0_27, %c0_28, %c0_29] : memref<2x32x1024xf32, #tpu.memory_space<vmem>>, vector<1x32x1024xf32>
    %45 = vector.shape_cast %44 : vector<1x32x1024xf32> to vector<32x1024xf32>
    %cst_30 = arith.constant dense<0.000000e+00> : vector<4x1024xf32>
    %46 = tpu.matmul %43, %45, %cst_30 {dimension_numbers = #tpu.dot_dimension_numbers<[1], [0], [0], [1], [0, 0, 1, 1], [], []>} : vector<4x32xf32>, vector<32x1024xf32>, vector<4x1024xf32> -> vector<4x1024xf32>
    %cst_31 = arith.constant 0.000000e+00 : f32
    %47 = vector.broadcast %cst_31 : f32 to vector<4x128xf32>
    %48 = vector.extract_strided_slice %46 {offsets = [0, 0], sizes = [4, 128], strides = [1, 1]} : vector<4x1024xf32> to vector<4x128xf32>
    %cst_32 = arith.constant 0.176776692 : f32
    %49 = vector.broadcast %cst_32 : f32 to vector<4x128xf32>
    %50 = arith.mulf %48, %49 : vector<4x128xf32>
    %51 = arith.subf %50, %33 : vector<4x128xf32>
    %52 = math.tanh %51 : vector<4x128xf32>
    %cst_33 = arith.constant 5.000000e+01 : f32
    %53 = vector.broadcast %cst_33 : f32 to vector<4x128xf32>
    %54 = arith.mulf %53, %52 : vector<4x128xf32>
    %55 = arith.addf %54, %41 : vector<4x128xf32>
    %cst_34 = arith.constant dense<0xFF800000> : vector<4xf32>
    %56 = vector.multi_reduction <maximumf>, %55, %cst_34 [1] : vector<4x128xf32> to vector<4xf32>
    %57 = vector.shape_cast %56 : vector<4xf32> to vector<4x1xf32>
    %58 = vector.broadcast %57 : vector<4x1xf32> to vector<4x128xf32>
    %59 = arith.subf %55, %58 : vector<4x128xf32>
    %60 = math.exp %59 : vector<4x128xf32>
    %cst_35 = arith.constant dense<0.000000e+00> : vector<4xf32>
    %61 = vector.multi_reduction <add>, %60, %cst_35 [1] : vector<4x128xf32> to vector<4xf32>
    %62 = vector.shape_cast %61 : vector<4xf32> to vector<4x1xf32>
    %63 = tpu.reciprocal %62 {approx = true} : vector<4x1xf32> -> vector<4x1xf32>
    %64 = vector.broadcast %63 : vector<4x1xf32> to vector<4x128xf32>
    %65 = arith.mulf %60, %64 : vector<4x128xf32>
    %66 = arith.addf %47, %65 : vector<4x128xf32>
    %67 = vector.extract_strided_slice %46 {offsets = [0, 128], sizes = [4, 128], strides = [1, 1]} : vector<4x1024xf32> to vector<4x128xf32>
    %cst_36 = arith.constant 0.176776692 : f32
    %68 = vector.broadcast %cst_36 : f32 to vector<4x128xf32>
    %69 = arith.mulf %67, %68 : vector<4x128xf32>
    %70 = arith.subf %69, %33 : vector<4x128xf32>
    %71 = math.tanh %70 : vector<4x128xf32>
    %cst_37 = arith.constant 5.000000e+01 : f32
    %72 = vector.broadcast %cst_37 : f32 to vector<4x128xf32>
    %73 = arith.mulf %72, %71 : vector<4x128xf32>
    %74 = arith.addf %73, %41 : vector<4x128xf32>
    %cst_38 = arith.constant dense<0xFF800000> : vector<4xf32>
    %75 = vector.multi_reduction <maximumf>, %74, %cst_38 [1] : vector<4x128xf32> to vector<4xf32>
    %76 = vector.shape_cast %75 : vector<4xf32> to vector<4x1xf32>
    %77 = vector.broadcast %76 : vector<4x1xf32> to vector<4x128xf32>
    %78 = arith.subf %74, %77 : vector<4x128xf32>
    %79 = math.exp %78 : vector<4x128xf32>
    %cst_39 = arith.constant dense<0.000000e+00> : vector<4xf32>
    %80 = vector.multi_reduction <add>, %79, %cst_39 [1] : vector<4x128xf32> to vector<4xf32>
    %81 = vector.shape_cast %80 : vector<4xf32> to vector<4x1xf32>
    %82 = tpu.reciprocal %81 {approx = true} : vector<4x1xf32> -> vector<4x1xf32>
    %83 = vector.broadcast %82 : vector<4x1xf32> to vector<4x128xf32>
    %84 = arith.mulf %79, %83 : vector<4x128xf32>
    %85 = arith.addf %66, %84 : vector<4x128xf32>
    %86 = vector.extract_strided_slice %46 {offsets = [0, 256], sizes = [4, 128], strides = [1, 1]} : vector<4x1024xf32> to vector<4x128xf32>
    %cst_40 = arith.constant 0.176776692 : f32
    %87 = vector.broadcast %cst_40 : f32 to vector<4x128xf32>
    %88 = arith.mulf %86, %87 : vector<4x128xf32>
    %89 = arith.subf %88, %33 : vector<4x128xf32>
    %90 = math.tanh %89 : vector<4x128xf32>
    %cst_41 = arith.constant 5.000000e+01 : f32
    %91 = vector.broadcast %cst_41 : f32 to vector<4x128xf32>
    %92 = arith.mulf %91, %90 : vector<4x128xf32>
    %93 = arith.addf %92, %41 : vector<4x128xf32>
    %cst_42 = arith.constant dense<0xFF800000> : vector<4xf32>
    %94 = vector.multi_reduction <maximumf>, %93, %cst_42 [1] : vector<4x128xf32> to vector<4xf32>
    %95 = vector.shape_cast %94 : vector<4xf32> to vector<4x1xf32>
    %96 = vector.broadcast %95 : vector<4x1xf32> to vector<4x128xf32>
    %97 = arith.subf %93, %96 : vector<4x128xf32>
    %98 = math.exp %97 : vector<4x128xf32>
    %cst_43 = arith.constant dense<0.000000e+00> : vector<4xf32>
    %99 = vector.multi_reduction <add>, %98, %cst_43 [1] : vector<4x128xf32> to vector<4xf32>
    %100 = vector.shape_cast %99 : vector<4xf32> to vector<4x1xf32>
    %101 = tpu.reciprocal %100 {approx = true} : vector<4x1xf32> -> vector<4x1xf32>
    %102 = vector.broadcast %101 : vector<4x1xf32> to vector<4x128xf32>
    %103 = arith.mulf %98, %102 : vector<4x128xf32>
    %104 = arith.addf %85, %103 : vector<4x128xf32>
    %105 = vector.extract_strided_slice %46 {offsets = [0, 384], sizes = [4, 128], strides = [1, 1]} : vector<4x1024xf32> to vector<4x128xf32>
    %cst_44 = arith.constant 0.176776692 : f32
    %106 = vector.broadcast %cst_44 : f32 to vector<4x128xf32>
    %107 = arith.mulf %105, %106 : vector<4x128xf32>
    %108 = arith.subf %107, %33 : vector<4x128xf32>
    %109 = math.tanh %108 : vector<4x128xf32>
    %cst_45 = arith.constant 5.000000e+01 : f32
    %110 = vector.broadcast %cst_45 : f32 to vector<4x128xf32>
    %111 = arith.mulf %110, %109 : vector<4x128xf32>
    %112 = arith.addf %111, %41 : vector<4x128xf32>
    %cst_46 = arith.constant dense<0xFF800000> : vector<4xf32>
    %113 = vector.multi_reduction <maximumf>, %112, %cst_46 [1] : vector<4x128xf32> to vector<4xf32>
    %114 = vector.shape_cast %113 : vector<4xf32> to vector<4x1xf32>
    %115 = vector.broadcast %114 : vector<4x1xf32> to vector<4x128xf32>
    %116 = arith.subf %112, %115 : vector<4x128xf32>
    %117 = math.exp %116 : vector<4x128xf32>
    %cst_47 = arith.constant dense<0.000000e+00> : vector<4xf32>
    %118 = vector.multi_reduction <add>, %117, %cst_47 [1] : vector<4x128xf32> to vector<4xf32>
    %119 = vector.shape_cast %118 : vector<4xf32> to vector<4x1xf32>
    %120 = tpu.reciprocal %119 {approx = true} : vector<4x1xf32> -> vector<4x1xf32>
    %121 = vector.broadcast %120 : vector<4x1xf32> to vector<4x128xf32>
    %122 = arith.mulf %117, %121 : vector<4x128xf32>
    %123 = arith.addf %104, %122 : vector<4x128xf32>
    %124 = vector.extract_strided_slice %46 {offsets = [0, 512], sizes = [4, 128], strides = [1, 1]} : vector<4x1024xf32> to vector<4x128xf32>
    %cst_48 = arith.constant 0.176776692 : f32
    %125 = vector.broadcast %cst_48 : f32 to vector<4x128xf32>
    %126 = arith.mulf %124, %125 : vector<4x128xf32>
    %127 = arith.subf %126, %33 : vector<4x128xf32>
    %128 = math.tanh %127 : vector<4x128xf32>
    %cst_49 = arith.constant 5.000000e+01 : f32
    %129 = vector.broadcast %cst_49 : f32 to vector<4x128xf32>
    %130 = arith.mulf %129, %128 : vector<4x128xf32>
    %131 = arith.addf %130, %41 : vector<4x128xf32>
    %cst_50 = arith.constant dense<0xFF800000> : vector<4xf32>
    %132 = vector.multi_reduction <maximumf>, %131, %cst_50 [1] : vector<4x128xf32> to vector<4xf32>
    %133 = vector.shape_cast %132 : vector<4xf32> to vector<4x1xf32>
    %134 = vector.broadcast %133 : vector<4x1xf32> to vector<4x128xf32>
    %135 = arith.subf %131, %134 : vector<4x128xf32>
    %136 = math.exp %135 : vector<4x128xf32>
    %cst_51 = arith.constant dense<0.000000e+00> : vector<4xf32>
    %137 = vector.multi_reduction <add>, %136, %cst_51 [1] : vector<4x128xf32> to vector<4xf32>
    %138 = vector.shape_cast %137 : vector<4xf32> to vector<4x1xf32>
    %139 = tpu.reciprocal %138 {approx = true} : vector<4x1xf32> -> vector<4x1xf32>
    %140 = vector.broadcast %139 : vector<4x1xf32> to vector<4x128xf32>
    %141 = arith.mulf %136, %140 : vector<4x128xf32>
    %142 = arith.addf %123, %141 : vector<4x128xf32>
    %143 = vector.extract_strided_slice %46 {offsets = [0, 640], sizes = [4, 128], strides = [1, 1]} : vector<4x1024xf32> to vector<4x128xf32>
    %cst_52 = arith.constant 0.176776692 : f32
    %144 = vector.broadcast %cst_52 : f32 to vector<4x128xf32>
    %145 = arith.mulf %143, %144 : vector<4x128xf32>
    %146 = arith.subf %145, %33 : vector<4x128xf32>
    %147 = math.tanh %146 : vector<4x128xf32>
    %cst_53 = arith.constant 5.000000e+01 : f32
    %148 = vector.broadcast %cst_53 : f32 to vector<4x128xf32>
    %149 = arith.mulf %148, %147 : vector<4x128xf32>
    %150 = arith.addf %149, %41 : vector<4x128xf32>
    %cst_54 = arith.constant dense<0xFF800000> : vector<4xf32>
    %151 = vector.multi_reduction <maximumf>, %150, %cst_54 [1] : vector<4x128xf32> to vector<4xf32>
    %152 = vector.shape_cast %151 : vector<4xf32> to vector<4x1xf32>
    %153 = vector.broadcast %152 : vector<4x1xf32> to vector<4x128xf32>
    %154 = arith.subf %150, %153 : vector<4x128xf32>
    %155 = math.exp %154 : vector<4x128xf32>
    %cst_55 = arith.constant dense<0.000000e+00> : vector<4xf32>
    %156 = vector.multi_reduction <add>, %155, %cst_55 [1] : vector<4x128xf32> to vector<4xf32>
    %157 = vector.shape_cast %156 : vector<4xf32> to vector<4x1xf32>
    %158 = tpu.reciprocal %157 {approx = true} : vector<4x1xf32> -> vector<4x1xf32>
    %159 = vector.broadcast %158 : vector<4x1xf32> to vector<4x128xf32>
    %160 = arith.mulf %155, %159 : vector<4x128xf32>
    %161 = arith.addf %142, %160 : vector<4x128xf32>
    %162 = vector.extract_strided_slice %46 {offsets = [0, 768], sizes = [4, 128], strides = [1, 1]} : vector<4x1024xf32> to vector<4x128xf32>
    %cst_56 = arith.constant 0.176776692 : f32
    %163 = vector.broadcast %cst_56 : f32 to vector<4x128xf32>
    %164 = arith.mulf %162, %163 : vector<4x128xf32>
    %165 = arith.subf %164, %33 : vector<4x128xf32>
    %166 = math.tanh %165 : vector<4x128xf32>
    %cst_57 = arith.constant 5.000000e+01 : f32
    %167 = vector.broadcast %cst_57 : f32 to vector<4x128xf32>
    %168 = arith.mulf %167, %166 : vector<4x128xf32>
    %169 = arith.addf %168, %41 : vector<4x128xf32>
    %cst_58 = arith.constant dense<0xFF800000> : vector<4xf32>
    %170 = vector.multi_reduction <maximumf>, %169, %cst_58 [1] : vector<4x128xf32> to vector<4xf32>
    %171 = vector.shape_cast %170 : vector<4xf32> to vector<4x1xf32>
    %172 = vector.broadcast %171 : vector<4x1xf32> to vector<4x128xf32>
    %173 = arith.subf %169, %172 : vector<4x128xf32>
    %174 = math.exp %173 : vector<4x128xf32>
    %cst_59 = arith.constant dense<0.000000e+00> : vector<4xf32>
    %175 = vector.multi_reduction <add>, %174, %cst_59 [1] : vector<4x128xf32> to vector<4xf32>
    %176 = vector.shape_cast %175 : vector<4xf32> to vector<4x1xf32>
    %177 = tpu.reciprocal %176 {approx = true} : vector<4x1xf32> -> vector<4x1xf32>
    %178 = vector.broadcast %177 : vector<4x1xf32> to vector<4x128xf32>
    %179 = arith.mulf %174, %178 : vector<4x128xf32>
    %180 = arith.addf %161, %179 : vector<4x128xf32>
    %181 = vector.extract_strided_slice %46 {offsets = [0, 896], sizes = [4, 128], strides = [1, 1]} : vector<4x1024xf32> to vector<4x128xf32>
    %cst_60 = arith.constant 0.176776692 : f32
    %182 = vector.broadcast %cst_60 : f32 to vector<4x128xf32>
    %183 = arith.mulf %181, %182 : vector<4x128xf32>
    %184 = arith.subf %183, %33 : vector<4x128xf32>
    %185 = math.tanh %184 : vector<4x128xf32>
    %cst_61 = arith.constant 5.000000e+01 : f32
    %186 = vector.broadcast %cst_61 : f32 to vector<4x128xf32>
    %187 = arith.mulf %186, %185 : vector<4x128xf32>
    %188 = arith.addf %187, %41 : vector<4x128xf32>
    %cst_62 = arith.constant dense<0xFF800000> : vector<4xf32>
    %189 = vector.multi_reduction <maximumf>, %188, %cst_62 [1] : vector<4x128xf32> to vector<4xf32>
    %190 = vector.shape_cast %189 : vector<4xf32> to vector<4x1xf32>
    %191 = vector.broadcast %190 : vector<4x1xf32> to vector<4x128xf32>
    %192 = arith.subf %188, %191 : vector<4x128xf32>
    %193 = math.exp %192 : vector<4x128xf32>
    %cst_63 = arith.constant dense<0.000000e+00> : vector<4xf32>
    %194 = vector.multi_reduction <add>, %193, %cst_63 [1] : vector<4x128xf32> to vector<4xf32>
    %195 = vector.shape_cast %194 : vector<4xf32> to vector<4x1xf32>
    %196 = tpu.reciprocal %195 {approx = true} : vector<4x1xf32> -> vector<4x1xf32>
    %197 = vector.broadcast %196 : vector<4x1xf32> to vector<4x128xf32>
    %198 = arith.mulf %193, %197 : vector<4x128xf32>
    %199 = arith.addf %180, %198 : vector<4x128xf32>
    %cst_64 = arith.constant 1.250000e-01 : f32
    %200 = vector.broadcast %cst_64 : f32 to vector<4x128xf32>
    %201 = arith.mulf %199, %200 : vector<4x128xf32>
    %c0_65 = arith.constant 0 : index
    %c0_66 = arith.constant 0 : index
    %c0_67 = arith.constant 0 : index
    %202 = vector.load %arg9[%c0_65, %c0_66, %c0_67] : memref<2x4x128xf32, #tpu.memory_space<vmem>>, vector<1x4x128xf32>
    %203 = vector.shape_cast %202 : vector<1x4x128xf32> to vector<4x128xf32>
    %204 = vector.shape_cast %201 : vector<4x128xf32> to vector<1x4x128xf32>
    tpu.vector_store %arg9[%c0_65, %c0_66, %c0_67], %204 {strides = array<i32>} : memref<2x4x128xf32, #tpu.memory_space<vmem>>, vector<1x4x128xf32>,
    %c1 = arith.constant 1 : index
    %c0_68 = arith.constant 0 : index
    %c0_69 = arith.constant 0 : index
    %205 = vector.load %arg7[%c1, %c0_68, %c0_69] : memref<2x4x128xf32, #tpu.memory_space<vmem>>, vector<1x4x128xf32>
    %206 = vector.shape_cast %205 : vector<1x4x128xf32> to vector<4x128xf32>
    %c1_70 = arith.constant 1 : index
    %c0_71 = arith.constant 0 : index
    %c0_72 = arith.constant 0 : index
    %207 = vector.load %arg8[%c1_70, %c0_71, %c0_72] : memref<2x4x128xf32, #tpu.memory_space<vmem>>, vector<1x4x128xf32>
    %208 = vector.shape_cast %207 : vector<1x4x128xf32> to vector<4x128xf32>
    %c1_73 = arith.constant 1 : index
    %c0_74 = arith.constant 0 : index
    %c0_75 = arith.constant 0 : index
    %209 = vector.load %arg5[%c1_73, %c0_74, %c0_75] : memref<2x128x128xf32, #tpu.memory_space<vmem>>, vector<1x128x128xf32>
    %210 = vector.shape_cast %209 : vector<1x128x128xf32> to vector<128x128xf32>
    %cst_76 = arith.constant dense<0.000000e+00> : vector<4x128xf32>
    %211 = tpu.matmul %206, %210, %cst_76 {dimension_numbers = #tpu.dot_dimension_numbers<[1], [0], [0], [1], [0, 0, 1, 1], [], []>} : vector<4x128xf32>, vector<128x128xf32>, vector<4x128xf32> -> vector<4x128xf32>
    %cst_77 = arith.constant 0.000000e+00 : f32
    %212 = vector.broadcast %cst_77 : f32 to vector<4x128xf32>
    %213 = arith.cmpf one, %206, %212 : vector<4x128xf32>
    %c1_78 = arith.constant 1 : index
    %c0_79 = arith.constant 0 : index
    %c0_80 = arith.constant 0 : index
    %214 = vector.load %arg6[%c1_78, %c0_79, %c0_80] : memref<2x1x128xf32, #tpu.memory_space<vmem>>, vector<1x1x128xf32>
    %215 = vector.shape_cast %214 : vector<1x1x128xf32> to vector<1x128xf32>
    %cst_81 = arith.constant 5.000000e-02 : f32
    %216 = vector.broadcast %cst_81 : f32 to vector<4x128xf32>
    %217 = vector.shape_cast %215 : vector<1x128xf32> to vector<1x128xf32>
    %218 = vector.broadcast %217 : vector<1x128xf32> to vector<4x128xf32>
    %219 = arith.select %213, %216, %218 : vector<4x128xi1>, vector<4x128xf32>
    %220 = arith.mulf %211, %219 : vector<4x128xf32>
    %cst_82 = arith.constant 0xFF800000 : f32
    %221 = vector.broadcast %cst_82 : f32 to vector<4x128xf32>
    %222 = arith.cmpf oeq, %208, %221 : vector<4x128xf32>
    %cst_83 = arith.constant 0x7F800000 : f32
    %223 = vector.broadcast %cst_83 : f32 to vector<4x128xf32>
    %224 = arith.cmpf oeq, %208, %223 : vector<4x128xf32>
    %cst_84 = arith.constant 1.000000e+08 : f32
    %225 = vector.broadcast %cst_84 : f32 to vector<4x128xf32>
    %226 = arith.select %224, %225, %208 : vector<4x128xi1>, vector<4x128xf32>
    %cst_85 = arith.constant -1.000000e+08 : f32
    %227 = vector.broadcast %cst_85 : f32 to vector<4x128xf32>
    %228 = arith.select %222, %227, %226 : vector<4x128xi1>, vector<4x128xf32>
    %229 = vector.extract_strided_slice %17 {offsets = [1, 0, 0], sizes = [1, 4, 32], strides = [1, 1, 1]} : vector<2x4x32xf32> to vector<1x4x32xf32>
    %230 = vector.shape_cast %229 : vector<1x4x32xf32> to vector<4x32xf32>
    %c1_86 = arith.constant 1 : index
    %c0_87 = arith.constant 0 : index
    %c0_88 = arith.constant 0 : index
    %231 = vector.load %arg4[%c1_86, %c0_87, %c0_88] : memref<2x32x1024xf32, #tpu.memory_space<vmem>>, vector<1x32x1024xf32>
    %232 = vector.shape_cast %231 : vector<1x32x1024xf32> to vector<32x1024xf32>
    %cst_89 = arith.constant dense<0.000000e+00> : vector<4x1024xf32>
    %233 = tpu.matmul %230, %232, %cst_89 {dimension_numbers = #tpu.dot_dimension_numbers<[1], [0], [0], [1], [0, 0, 1, 1], [], []>} : vector<4x32xf32>, vector<32x1024xf32>, vector<4x1024xf32> -> vector<4x1024xf32>
    %cst_90 = arith.constant 0.000000e+00 : f32
    %234 = vector.broadcast %cst_90 : f32 to vector<4x128xf32>
    %235 = vector.extract_strided_slice %233 {offsets = [0, 0], sizes = [4, 128], strides = [1, 1]} : vector<4x1024xf32> to vector<4x128xf32>
    %cst_91 = arith.constant 0.176776692 : f32
    %236 = vector.broadcast %cst_91 : f32 to vector<4x128xf32>
    %237 = arith.mulf %235, %236 : vector<4x128xf32>
    %238 = arith.subf %237, %220 : vector<4x128xf32>
    %239 = math.tanh %238 : vector<4x128xf32>
    %cst_92 = arith.constant 5.000000e+01 : f32
    %240 = vector.broadcast %cst_92 : f32 to vector<4x128xf32>
    %241 = arith.mulf %240, %239 : vector<4x128xf32>
    %242 = arith.addf %241, %228 : vector<4x128xf32>
    %cst_93 = arith.constant dense<0xFF800000> : vector<4xf32>
    %243 = vector.multi_reduction <maximumf>, %242, %cst_93 [1] : vector<4x128xf32> to vector<4xf32>
    %244 = vector.shape_cast %243 : vector<4xf32> to vector<4x1xf32>
    %245 = vector.broadcast %244 : vector<4x1xf32> to vector<4x128xf32>
    %246 = arith.subf %242, %245 : vector<4x128xf32>
    %247 = math.exp %246 : vector<4x128xf32>
    %cst_94 = arith.constant dense<0.000000e+00> : vector<4xf32>
    %248 = vector.multi_reduction <add>, %247, %cst_94 [1] : vector<4x128xf32> to vector<4xf32>
    %249 = vector.shape_cast %248 : vector<4xf32> to vector<4x1xf32>
    %250 = tpu.reciprocal %249 {approx = true} : vector<4x1xf32> -> vector<4x1xf32>
    %251 = vector.broadcast %250 : vector<4x1xf32> to vector<4x128xf32>
    %252 = arith.mulf %247, %251 : vector<4x128xf32>
    %253 = arith.addf %234, %252 : vector<4x128xf32>
    %254 = vector.extract_strided_slice %233 {offsets = [0, 128], sizes = [4, 128], strides = [1, 1]} : vector<4x1024xf32> to vector<4x128xf32>
    %cst_95 = arith.constant 0.176776692 : f32
    %255 = vector.broadcast %cst_95 : f32 to vector<4x128xf32>
    %256 = arith.mulf %254, %255 : vector<4x128xf32>
    %257 = arith.subf %256, %220 : vector<4x128xf32>
    %258 = math.tanh %257 : vector<4x128xf32>
    %cst_96 = arith.constant 5.000000e+01 : f32
    %259 = vector.broadcast %cst_96 : f32 to vector<4x128xf32>
    %260 = arith.mulf %259, %258 : vector<4x128xf32>
    %261 = arith.addf %260, %228 : vector<4x128xf32>
    %cst_97 = arith.constant dense<0xFF800000> : vector<4xf32>
    %262 = vector.multi_reduction <maximumf>, %261, %cst_97 [1] : vector<4x128xf32> to vector<4xf32>
    %263 = vector.shape_cast %262 : vector<4xf32> to vector<4x1xf32>
    %264 = vector.broadcast %263 : vector<4x1xf32> to vector<4x128xf32>
    %265 = arith.subf %261, %264 : vector<4x128xf32>
    %266 = math.exp %265 : vector<4x128xf32>
    %cst_98 = arith.constant dense<0.000000e+00> : vector<4xf32>
    %267 = vector.multi_reduction <add>, %266, %cst_98 [1] : vector<4x128xf32> to vector<4xf32>
    %268 = vector.shape_cast %267 : vector<4xf32> to vector<4x1xf32>
    %269 = tpu.reciprocal %268 {approx = true} : vector<4x1xf32> -> vector<4x1xf32>
    %270 = vector.broadcast %269 : vector<4x1xf32> to vector<4x128xf32>
    %271 = arith.mulf %266, %270 : vector<4x128xf32>
    %272 = arith.addf %253, %271 : vector<4x128xf32>
    %273 = vector.extract_strided_slice %233 {offsets = [0, 256], sizes = [4, 128], strides = [1, 1]} : vector<4x1024xf32> to vector<4x128xf32>
    %cst_99 = arith.constant 0.176776692 : f32
    %274 = vector.broadcast %cst_99 : f32 to vector<4x128xf32>
    %275 = arith.mulf %273, %274 : vector<4x128xf32>
    %276 = arith.subf %275, %220 : vector<4x128xf32>
    %277 = math.tanh %276 : vector<4x128xf32>
    %cst_100 = arith.constant 5.000000e+01 : f32
    %278 = vector.broadcast %cst_100 : f32 to vector<4x128xf32>
    %279 = arith.mulf %278, %277 : vector<4x128xf32>
    %280 = arith.addf %279, %228 : vector<4x128xf32>
    %cst_101 = arith.constant dense<0xFF800000> : vector<4xf32>
    %281 = vector.multi_reduction <maximumf>, %280, %cst_101 [1] : vector<4x128xf32> to vector<4xf32>
    %282 = vector.shape_cast %281 : vector<4xf32> to vector<4x1xf32>
    %283 = vector.broadcast %282 : vector<4x1xf32> to vector<4x128xf32>
    %284 = arith.subf %280, %283 : vector<4x128xf32>
    %285 = math.exp %284 : vector<4x128xf32>
    %cst_102 = arith.constant dense<0.000000e+00> : vector<4xf32>
    %286 = vector.multi_reduction <add>, %285, %cst_102 [1] : vector<4x128xf32> to vector<4xf32>
    %287 = vector.shape_cast %286 : vector<4xf32> to vector<4x1xf32>
    %288 = tpu.reciprocal %287 {approx = true} : vector<4x1xf32> -> vector<4x1xf32>
    %289 = vector.broadcast %288 : vector<4x1xf32> to vector<4x128xf32>
    %290 = arith.mulf %285, %289 : vector<4x128xf32>
    %291 = arith.addf %272, %290 : vector<4x128xf32>
    %292 = vector.extract_strided_slice %233 {offsets = [0, 384], sizes = [4, 128], strides = [1, 1]} : vector<4x1024xf32> to vector<4x128xf32>
    %cst_103 = arith.constant 0.176776692 : f32
    %293 = vector.broadcast %cst_103 : f32 to vector<4x128xf32>
    %294 = arith.mulf %292, %293 : vector<4x128xf32>
    %295 = arith.subf %294, %220 : vector<4x128xf32>
    %296 = math.tanh %295 : vector<4x128xf32>
    %cst_104 = arith.constant 5.000000e+01 : f32
    %297 = vector.broadcast %cst_104 : f32 to vector<4x128xf32>
    %298 = arith.mulf %297, %296 : vector<4x128xf32>
    %299 = arith.addf %298, %228 : vector<4x128xf32>
    %cst_105 = arith.constant dense<0xFF800000> : vector<4xf32>
    %300 = vector.multi_reduction <maximumf>, %299, %cst_105 [1] : vector<4x128xf32> to vector<4xf32>
    %301 = vector.shape_cast %300 : vector<4xf32> to vector<4x1xf32>
    %302 = vector.broadcast %301 : vector<4x1xf32> to vector<4x128xf32>
    %303 = arith.subf %299, %302 : vector<4x128xf32>
    %304 = math.exp %303 : vector<4x128xf32>
    %cst_106 = arith.constant dense<0.000000e+00> : vector<4xf32>
    %305 = vector.multi_reduction <add>, %304, %cst_106 [1] : vector<4x128xf32> to vector<4xf32>
    %306 = vector.shape_cast %305 : vector<4xf32> to vector<4x1xf32>
    %307 = tpu.reciprocal %306 {approx = true} : vector<4x1xf32> -> vector<4x1xf32>
    %308 = vector.broadcast %307 : vector<4x1xf32> to vector<4x128xf32>
    %309 = arith.mulf %304, %308 : vector<4x128xf32>
    %310 = arith.addf %291, %309 : vector<4x128xf32>
    %311 = vector.extract_strided_slice %233 {offsets = [0, 512], sizes = [4, 128], strides = [1, 1]} : vector<4x1024xf32> to vector<4x128xf32>
    %cst_107 = arith.constant 0.176776692 : f32
    %312 = vector.broadcast %cst_107 : f32 to vector<4x128xf32>
    %313 = arith.mulf %311, %312 : vector<4x128xf32>
    %314 = arith.subf %313, %220 : vector<4x128xf32>
    %315 = math.tanh %314 : vector<4x128xf32>
    %cst_108 = arith.constant 5.000000e+01 : f32
    %316 = vector.broadcast %cst_108 : f32 to vector<4x128xf32>
    %317 = arith.mulf %316, %315 : vector<4x128xf32>
    %318 = arith.addf %317, %228 : vector<4x128xf32>
    %cst_109 = arith.constant dense<0xFF800000> : vector<4xf32>
    %319 = vector.multi_reduction <maximumf>, %318, %cst_109 [1] : vector<4x128xf32> to vector<4xf32>
    %320 = vector.shape_cast %319 : vector<4xf32> to vector<4x1xf32>
    %321 = vector.broadcast %320 : vector<4x1xf32> to vector<4x128xf32>
    %322 = arith.subf %318, %321 : vector<4x128xf32>
    %323 = math.exp %322 : vector<4x128xf32>
    %cst_110 = arith.constant dense<0.000000e+00> : vector<4xf32>
    %324 = vector.multi_reduction <add>, %323, %cst_110 [1] : vector<4x128xf32> to vector<4xf32>
    %325 = vector.shape_cast %324 : vector<4xf32> to vector<4x1xf32>
    %326 = tpu.reciprocal %325 {approx = true} : vector<4x1xf32> -> vector<4x1xf32>
    %327 = vector.broadcast %326 : vector<4x1xf32> to vector<4x128xf32>
    %328 = arith.mulf %323, %327 : vector<4x128xf32>
    %329 = arith.addf %310, %328 : vector<4x128xf32>
    %330 = vector.extract_strided_slice %233 {offsets = [0, 640], sizes = [4, 128], strides = [1, 1]} : vector<4x1024xf32> to vector<4x128xf32>
    %cst_111 = arith.constant 0.176776692 : f32
    %331 = vector.broadcast %cst_111 : f32 to vector<4x128xf32>
    %332 = arith.mulf %330, %331 : vector<4x128xf32>
    %333 = arith.subf %332, %220 : vector<4x128xf32>
    %334 = math.tanh %333 : vector<4x128xf32>
    %cst_112 = arith.constant 5.000000e+01 : f32
    %335 = vector.broadcast %cst_112 : f32 to vector<4x128xf32>
    %336 = arith.mulf %335, %334 : vector<4x128xf32>
    %337 = arith.addf %336, %228 : vector<4x128xf32>
    %cst_113 = arith.constant dense<0xFF800000> : vector<4xf32>
    %338 = vector.multi_reduction <maximumf>, %337, %cst_113 [1] : vector<4x128xf32> to vector<4xf32>
    %339 = vector.shape_cast %338 : vector<4xf32> to vector<4x1xf32>
    %340 = vector.broadcast %339 : vector<4x1xf32> to vector<4x128xf32>
    %341 = arith.subf %337, %340 : vector<4x128xf32>
    %342 = math.exp %341 : vector<4x128xf32>
    %cst_114 = arith.constant dense<0.000000e+00> : vector<4xf32>
    %343 = vector.multi_reduction <add>, %342, %cst_114 [1] : vector<4x128xf32> to vector<4xf32>
    %344 = vector.shape_cast %343 : vector<4xf32> to vector<4x1xf32>
    %345 = tpu.reciprocal %344 {approx = true} : vector<4x1xf32> -> vector<4x1xf32>
    %346 = vector.broadcast %345 : vector<4x1xf32> to vector<4x128xf32>
    %347 = arith.mulf %342, %346 : vector<4x128xf32>
    %348 = arith.addf %329, %347 : vector<4x128xf32>
    %349 = vector.extract_strided_slice %233 {offsets = [0, 768], sizes = [4, 128], strides = [1, 1]} : vector<4x1024xf32> to vector<4x128xf32>
    %cst_115 = arith.constant 0.176776692 : f32
    %350 = vector.broadcast %cst_115 : f32 to vector<4x128xf32>
    %351 = arith.mulf %349, %350 : vector<4x128xf32>
    %352 = arith.subf %351, %220 : vector<4x128xf32>
    %353 = math.tanh %352 : vector<4x128xf32>
    %cst_116 = arith.constant 5.000000e+01 : f32
    %354 = vector.broadcast %cst_116 : f32 to vector<4x128xf32>
    %355 = arith.mulf %354, %353 : vector<4x128xf32>
    %356 = arith.addf %355, %228 : vector<4x128xf32>
    %cst_117 = arith.constant dense<0xFF800000> : vector<4xf32>
    %357 = vector.multi_reduction <maximumf>, %356, %cst_117 [1] : vector<4x128xf32> to vector<4xf32>
    %358 = vector.shape_cast %357 : vector<4xf32> to vector<4x1xf32>
    %359 = vector.broadcast %358 : vector<4x1xf32> to vector<4x128xf32>
    %360 = arith.subf %356, %359 : vector<4x128xf32>
    %361 = math.exp %360 : vector<4x128xf32>
    %cst_118 = arith.constant dense<0.000000e+00> : vector<4xf32>
    %362 = vector.multi_reduction <add>, %361, %cst_118 [1] : vector<4x128xf32> to vector<4xf32>
    %363 = vector.shape_cast %362 : vector<4xf32> to vector<4x1xf32>
    %364 = tpu.reciprocal %363 {approx = true} : vector<4x1xf32> -> vector<4x1xf32>
    %365 = vector.broadcast %364 : vector<4x1xf32> to vector<4x128xf32>
    %366 = arith.mulf %361, %365 : vector<4x128xf32>
    %367 = arith.addf %348, %366 : vector<4x128xf32>
    %368 = vector.extract_strided_slice %233 {offsets = [0, 896], sizes = [4, 128], strides = [1, 1]} : vector<4x1024xf32> to vector<4x128xf32>
    %cst_119 = arith.constant 0.176776692 : f32
    %369 = vector.broadcast %cst_119 : f32 to vector<4x128xf32>
    %370 = arith.mulf %368, %369 : vector<4x128xf32>
    %371 = arith.subf %370, %220 : vector<4x128xf32>
    %372 = math.tanh %371 : vector<4x128xf32>
    %cst_120 = arith.constant 5.000000e+01 : f32
    %373 = vector.broadcast %cst_120 : f32 to vector<4x128xf32>
    %374 = arith.mulf %373, %372 : vector<4x128xf32>
    %375 = arith.addf %374, %228 : vector<4x128xf32>
    %cst_121 = arith.constant dense<0xFF800000> : vector<4xf32>
    %376 = vector.multi_reduction <maximumf>, %375, %cst_121 [1] : vector<4x128xf32> to vector<4xf32>
    %377 = vector.shape_cast %376 : vector<4xf32> to vector<4x1xf32>
    %378 = vector.broadcast %377 : vector<4x1xf32> to vector<4x128xf32>
    %379 = arith.subf %375, %378 : vector<4x128xf32>
    %380 = math.exp %379 : vector<4x128xf32>
    %cst_122 = arith.constant dense<0.000000e+00> : vector<4xf32>
    %381 = vector.multi_reduction <add>, %380, %cst_122 [1] : vector<4x128xf32> to vector<4xf32>
    %382 = vector.shape_cast %381 : vector<4xf32> to vector<4x1xf32>
    %383 = tpu.reciprocal %382 {approx = true} : vector<4x1xf32> -> vector<4x1xf32>
    %384 = vector.broadcast %383 : vector<4x1xf32> to vector<4x128xf32>
    %385 = arith.mulf %380, %384 : vector<4x128xf32>
    %386 = arith.addf %367, %385 : vector<4x128xf32>
    %cst_123 = arith.constant 1.250000e-01 : f32
    %387 = vector.broadcast %cst_123 : f32 to vector<4x128xf32>
    %388 = arith.mulf %386, %387 : vector<4x128xf32>
    %c1_124 = arith.constant 1 : index
    %c0_125 = arith.constant 0 : index
    %c0_126 = arith.constant 0 : index
    %389 = vector.load %arg9[%c1_124, %c0_125, %c0_126] : memref<2x4x128xf32, #tpu.memory_space<vmem>>, vector<1x4x128xf32>
    %390 = vector.shape_cast %389 : vector<1x4x128xf32> to vector<4x128xf32>
    %391 = vector.shape_cast %388 : vector<4x128xf32> to vector<1x4x128xf32>
    tpu.vector_store %arg9[%c1_124, %c0_125, %c0_126], %391 {strides = array<i32>} : memref<2x4x128xf32, #tpu.memory_space<vmem>>, vector<1x4x128xf32>,
    return
  }
  func.func @transform_0(%arg0: i32) -> (i32, i32, i32) {
    %c0_i32 = arith.constant 0 : i32
    %c0_i32_0 = arith.constant 0 : i32
    %c0_i32_1 = arith.constant 0 : i32
    return %arg0, %c0_i32, %c0_i32_0 : i32, i32, i32
  }
  func.func @transform_1(%arg0: i32) -> (i32, i32, i32) {
    %c0_i32 = arith.constant 0 : i32
    %c0_i32_0 = arith.constant 0 : i32
    %c0_i32_1 = arith.constant 0 : i32
    return %arg0, %c0_i32, %c0_i32_0 : i32, i32, i32
  }
  func.func @transform_2(%arg0: i32) -> (i32, i32, i32) {
    %c0_i32 = arith.constant 0 : i32
    %c0_i32_0 = arith.constant 0 : i32
    %c0_i32_1 = arith.constant 0 : i32
    return %arg0, %c0_i32, %c0_i32_0 : i32, i32, i32
  }
  func.func @transform_3(%arg0: i32) -> (i32, i32, i32) {
    %c0_i32 = arith.constant 0 : i32
    %c0_i32_0 = arith.constant 0 : i32
    %c0_i32_1 = arith.constant 0 : i32
    return %arg0, %c0_i32, %c0_i32_0 : i32, i32, i32
  }
  func.func @transform_4(%arg0: i32) -> (i32, i32, i32) {
    %c0_i32 = arith.constant 0 : i32
    %c0_i32_0 = arith.constant 0 : i32
    %c0_i32_1 = arith.constant 0 : i32
    return %arg0, %c0_i32, %c0_i32_0 : i32, i32, i32
  }
  func.func @transform_5(%arg0: i32) -> (i32, i32, i32) {
    %c0_i32 = arith.constant 0 : i32
    %c0_i32_0 = arith.constant 0 : i32
    %c0_i32_1 = arith.constant 0 : i32
    return %arg0, %c0_i32, %c0_i32_0 : i32, i32, i32
  }
  func.func @transform_6(%arg0: i32) -> (i32, i32, i32) {
    %c0_i32 = arith.constant 0 : i32
    %c0_i32_0 = arith.constant 0 : i32
    %c0_i32_1 = arith.constant 0 : i32
    return %arg0, %c0_i32, %c0_i32_0 : i32, i32, i32
  }
  func.func @transform_7(%arg0: i32) -> (i32, i32, i32) {
    %c0_i32 = arith.constant 0 : i32
    %c0_i32_0 = arith.constant 0 : i32
    %c0_i32_1 = arith.constant 0 : i32
    return %arg0, %c0_i32, %c0_i32_0 : i32, i32, i32
  }
  func.func @transform_8(%arg0: i32) -> (i32, i32, i32) {
    %c0_i32 = arith.constant 0 : i32
    %c0_i32_0 = arith.constant 0 : i32
    %c0_i32_1 = arith.constant 0 : i32
    return %arg0, %c0_i32, %c0_i32_0 : i32, i32, i32
  }
}

</mosaic_0001>

<bundles_post_ra>
// kernel: tpu_custom_call.1
= control target key start
LH: loop header
LB: loop body
LE: loop exit
PB: predicated region body
PF: predicated region fallthrough
CT: control target
= control target key end

     0   :  { %13 = vsyncpa [#allocation3], 0  ;;  %s1689_s0 = inlined_call_operand.vmem [shape: s32[2,4,1], index: 0, kind: input, shape index: {}]   ;;  %s1690_s1 = inlined_call_operand.vmem [shape: f32[2,128,32], index: 1, kind: input, shape index: {}]   ;;  %s1691_s2 = inlined_call_operand.vmem [shape: f32[2,1,32], index: 2, kind: input, shape index: {}]   ;;  %s1692_s3 = inlined_call_operand.hbm [shape: f32[2,32,1024], index: 3, kind: input, shape index: {}]   ;;  %s1693_s4 = inlined_call_operand.vmem [shape: f32[2,128,128], index: 4, kind: input, shape index: {}]   ;;  %s1694_s5 = inlined_call_operand.vmem [shape: f32[2,1,128], index: 5, kind: input, shape index: {}]   ;;  %s1695_s6 = inlined_call_operand.vmem [shape: f32[2,4,128], index: 6, kind: input, shape index: {}]   ;;  %s1696_s7 = inlined_call_operand.vmem [shape: f32[2,4,128], index: 7, kind: input, shape index: {}]   ;;  %s1697_s8 = inlined_call_operand.hbm [shape: f32[2,4,128], index: 8, kind: output, shape index: {}]  }
   0x1   :  { %14 = vsyncpa [#allocation4], 0  ;;  %s25_s29 = sshll.u32 %s1692_s3, 4  ;;  %s1160_s30 = smov [#allocation2]   ;;  %s26_s29 = int_to_ptr.hbm [resolvable:$true] %s25_s29 }
   0x2   :  { %s27_s9 = sshll.u32 %s1160_s30, 4  ;;  %s1161_s10 = smov 1024   ;;  %s28_s9 = int_to_ptr.vmem [resolvable:$true] %s27_s9 }
   0x3   :  { %s1162_s11 = smov 64  }
   0x4   :  { %33 = dma.hbm_to_vmem [thread:$0]  %s26_s29, 8192, %s28_s9, [#allocation3], %s1161_s10, %s1161_s10, %s1162_s11  }
   0x5   :  { %1156 = dma.done.wait [#allocation3], 8192  }
   0x6   :  { %1157 = vsyncadd [#allocation3], 4294959104  ;;  %v1163_v0 = vmov 0   ;;  %v46_v1 = vld [vmem:[%s1689_s0] sm:$0xf]  ;;  %v94_v2 = vld [vmem:[%s1690_s1 + $0x78] sm:$0xff]  ;;  %v49_v36 = vlaneseq }
   0x7   :  { %1007 = vset.pattern.permute.xlu0 %v1163_v0  ;;  %118 = vmatpush.msra.mxu0 %v94_v2  ;;  %v110_v3 = vld [vmem:[%s1690_s1 + $0xf8] sm:$0xff]  ;;  %v93_v4 = vld [vmem:[%s1690_s1 + $0x70] sm:$0xff]  ;;  %v47_v6 = vld [vmem:[%s1689_s0 + $0x4] sm:$0xf]  ;;  %vm76_vm2 = vcmask 1043456   ;;  %v1164_v56 = vmov 0.0  }
   0x8   :  { %53 = vperm.xlu0 %1007, %v46_v1   ;;  %v109_v5 = vld [vmem:[%s1690_s1 + $0xf0] sm:$0xff]  ;;  %138 = vmatpush.msra.mxu1 %v110_v3  ;;  %v92_v7 = vld [vmem:[%s1690_s1 + $0x68] sm:$0xff]  ;;  %v91_v9 = vld [vmem:[%s1690_s1 + $0x60] sm:$0xff]  ;;  %v48_v10 = vadd.s32 128, %v47_v6  ;;  %v50_v40 = vand.u32 127, %v49_v36  ;;  %vm252_vm5 = vcmask 261120  }
   0x9   :  { %119 = vmatpush.msra.mxu0 %v93_v4  ;;  %v108_v8 = vld [vmem:[%s1690_s1 + $0xe8] sm:$0xff]  ;;  %v107_v11 = vld [vmem:[%s1690_s1 + $0xe0] sm:$0xff]  ;;  %v90_v12 = vld [vmem:[%s1690_s1 + $0x58] sm:$0xff]  ;;  %s948_s16 = sshll.u32 %s1697_s8, 4  ;;  %s1166_s17 = smov 4   ;;  %s949_s16 = int_to_ptr.hbm [resolvable:$true] %s948_s16 }
   0xa   :  { %139 = vmatpush.msra.mxu1 %v109_v5  ;;  %v106_v13 = vld [vmem:[%s1690_s1 + $0xd8] sm:$0xff]  ;;  %v89_v14 = vld [vmem:[%s1690_s1 + $0x50] sm:$0xff]  ;;  %v88_v16 = vld [vmem:[%s1690_s1 + $0x48] sm:$0xff]  ;;  %v51_v46 = vadd.s32 128, %v50_v40 }
   0xb   :  { %120 = vmatpush.msra.mxu0 %v92_v7  ;;  %v105_v15 = vld [vmem:[%s1690_s1 + $0xd0] sm:$0xff]  ;;  %v104_v17 = vld [vmem:[%s1690_s1 + $0xc8] sm:$0xff]  ;;  %v87_v18 = vld [vmem:[%s1690_s1 + $0x40] sm:$0xff] }
   0xc   :  { %140 = vmatpush.msra.mxu1 %v108_v8  ;;  %v103_v19 = vld [vmem:[%s1690_s1 + $0xc0] sm:$0xff]  ;;  %v86_v20 = vld [vmem:[%s1690_s1 + $0x38] sm:$0xff]  ;;  %v85_v22 = vld [vmem:[%s1690_s1 + $0x30] sm:$0xff] }
   0xd   :  { %121 = vmatpush.msra.mxu0 %v91_v9  ;;  %v102_v21 = vld [vmem:[%s1690_s1 + $0xb8] sm:$0xff]  ;;  %v101_v23 = vld [vmem:[%s1690_s1 + $0xb0] sm:$0xff]  ;;  %v84_v24 = vld [vmem:[%s1690_s1 + $0x28] sm:$0xff] }
   0xe   :  { %141 = vmatpush.msra.mxu1 %v107_v11  ;;  %v100_v25 = vld [vmem:[%s1690_s1 + $0xa8] sm:$0xff]  ;;  %v83_v26 = vld [vmem:[%s1690_s1 + $0x20] sm:$0xff]  ;;  %v82_v28 = vld [vmem:[%s1690_s1 + $0x18] sm:$0xff] }
   0xf   :  { %122 = vmatpush.msra.mxu0 %v90_v12  ;;  %v99_v27 = vld [vmem:[%s1690_s1 + $0xa0] sm:$0xff]  ;;  %v98_v29 = vld [vmem:[%s1690_s1 + $0x98] sm:$0xff]  ;;  %v81_v30 = vld [vmem:[%s1690_s1 + $0x10] sm:$0xff] }
  0x10   :  { %56 = vperm.xlu0 %1007, %v48_v10   ;;  %142 = vmatpush.msra.mxu1 %v106_v13  ;;  %v97_v31 = vld [vmem:[%s1690_s1 + $0x90] sm:$0xff]  ;;  %v80_v32 = vld [vmem:[%s1690_s1 + $0x8] sm:$0xff]  ;;  %v79_v34 = vld [vmem:[%s1690_s1] sm:$0xff] }
  0x11   :  { %123 = vmatpush.msra.mxu0 %v89_v14  ;;  %v96_v33 = vld [vmem:[%s1690_s1 + $0x88] sm:$0xff]  ;;  %v95_v35 = vld [vmem:[%s1690_s1 + $0x80] sm:$0xff]  ;;  %v188_v37 = vld [vmem:[%s1693_s4 + $0x78] sm:$0xff] }
  0x12   :  { %143 = vmatpush.msra.mxu1 %v105_v15  ;;  %v187_v38 = vld [vmem:[%s1693_s4 + $0x70] sm:$0xff]  ;;  %189 = vmatpush.msra.mxu2 %v188_v37  ;;  %v186_v39 = vld [vmem:[%s1693_s4 + $0x68] sm:$0xff]  ;;  %v990_v41 = vld [vmem:[%s1693_s4 + $0xf8] sm:$0xff] }
  0x13   :  { %124 = vmatpush.msra.mxu0 %v88_v16  ;;  %v989_v42 = vld [vmem:[%s1693_s4 + $0xf0] sm:$0xff]  ;;  %v185_v43 = vld [vmem:[%s1693_s4 + $0x60] sm:$0xff]  ;;  %v988_v44 = vld [vmem:[%s1693_s4 + $0xe8] sm:$0xff] }
  0x14   :  { %144 = vmatpush.msra.mxu1 %v104_v17  ;;  %190 = vmatpush.msra.mxu2 %v187_v38  ;;  %v184_v45 = vld [vmem:[%s1693_s4 + $0x58] sm:$0xff]  ;;  %v987_v47 = vld [vmem:[%s1693_s4 + $0xe0] sm:$0xff]  ;;  %v183_v48 = vld [vmem:[%s1693_s4 + $0x50] sm:$0xff] }
  0x15   :  { %125 = vmatpush.msra.mxu0 %v87_v18  ;;  %v249_v49 = vld [vmem:[#allocation2 + $0xe8] sm:$0xff]  ;;  %v244_v50 = vld [vmem:[#allocation2 + $0xc0] sm:$0xff]  ;;  %v986_v51 = vld [vmem:[%s1693_s4 + $0xd8] sm:$0xff] }
  0x16   :  { %145 = vmatpush.msra.mxu1 %v103_v19  ;;  %191 = vmatpush.msra.mxu2 %v186_v39  ;;  %v241_v52 = vld [vmem:[#allocation2 + $0xa8] sm:$0xff]  ;;  %v182_v54 = vld [vmem:[%s1693_s4 + $0x48] sm:$0xff]  ;;  %v181_v58 = vld [vmem:[%s1693_s4 + $0x40] sm:$0xff] }
  0x17   :  { %126 = vmatpush.msra.mxu0 %v86_v20  ;;  %268 = vmatpush.msra.mxu3 %v244_v50  ;;  %v985_v55 = vld [vmem:[%s1693_s4 + $0xd0] sm:$0xff]  ;;  %v984_v60 = vld [vmem:[%s1693_s4 + $0xc8] sm:$0xff]  ;;  %v180_v62 = vld [vmem:[%s1693_s4 + $0x38] sm:$0xff] }
  0x18   :  { %146 = vmatpush.msra.mxu1 %v102_v21  ;;  %192 = vmatpush.msra.mxu2 %v185_v43  ;;  %v983_v0 = vld [vmem:[%s1693_s4 + $0xc0] sm:$0xff]  ;;  %v179_v1 = vld [vmem:[%s1693_s4 + $0x30] sm:$0xff]  ;;  %v982_v2 = vld [vmem:[%s1693_s4 + $0xb8] sm:$0xff] }
  0x19   :  { %127 = vmatpush.msra.mxu0 %v85_v22  ;;  %v178_v4 = vld [vmem:[%s1693_s4 + $0x28] sm:$0xff]  ;;  %v177_v6 = vld [vmem:[%s1693_s4 + $0x20] sm:$0xff]  ;;  %v176_v9 = vld [vmem:[%s1693_s4 + $0x18] sm:$0xff] }
  0x1a   :  { %147 = vmatpush.msra.mxu1 %v101_v23  ;;  %193 = vmatpush.msra.mxu2 %v184_v45  ;;  %v175_v11 = vld [vmem:[%s1693_s4 + $0x10] sm:$0xff]  ;;  %v174_v12 = vld [vmem:[%s1693_s4 + $0x8] sm:$0xff]  ;;  %v173_v13 = vld [vmem:[%s1693_s4] sm:$0xff] }
  0x1b   :  { %128 = vmatpush.msra.mxu0 %v84_v24  ;;  %v1398_v14 = vld [vmem:[%s1695_s6] sm:$0xf]  ;;  %v250_v15 = vld [vmem:[#allocation2 + $0xf0] sm:$0xff]  ;;  %v236_v18 = vld [vmem:[#allocation2 + $0x80] sm:$0xff] }
  0x1c   :  { %148 = vmatpush.msra.mxu1 %v100_v25  ;;  %194 = vmatpush.msra.mxu2 %v183_v48  ;;  %v242_v19 = vld [vmem:[#allocation2 + $0xb0] sm:$0xff]  ;;  %v981_v20 = vld [vmem:[%s1693_s4 + $0xb0] sm:$0xff]  ;;  %v228_v22 = vld [vmem:[#allocation2 + $0x40] sm:$0xff]  ;;  %vm209_vm6 = vcmp.ne.f32.partialorder %v1398_v14, 0.0 }
  0x1d   :  { %129 = vmatpush.msra.mxu0 %v83_v26  ;;  %269 = vmatpush.msra.mxu3 %v236_v18  ;;  %v233_v21 = vld [vmem:[#allocation2 + $0x68] sm:$0xff]  ;;  %v234_v23 = vld [vmem:[#allocation2 + $0x70] sm:$0xff]  ;;  %v980_v24 = vld [vmem:[%s1693_s4 + $0xa8] sm:$0xff] }
  0x1e   :  { %149 = vmatpush.msra.mxu1 %v99_v27  ;;  %195 = vmatpush.msra.mxu2 %v182_v54  ;;  %v225_v25 = vld [vmem:[#allocation2 + $0x28] sm:$0xff]  ;;  %v220_v26 = vld [vmem:[#allocation2] sm:$0xff]  ;;  %v226_v27 = vld [vmem:[#allocation2 + $0x30] sm:$0xff] }
  0x1f   :  { %130 = vmatpush.msra.mxu0 %v82_v28  ;;  %270 = vmatpush.msra.mxu3 %v228_v22  ;;  %v979_v28 = vld [vmem:[%s1693_s4 + $0xa0] sm:$0xff]  ;;  %v625_v36 = vld [vmem:[#allocation2 + $0x188] sm:$0xff]  ;;  %v616_v37 = vld [vmem:[#allocation2 + $0x140] sm:$0xff] }
  0x20   :  { %150 = vmatpush.msra.mxu1 %v98_v29  ;;  %196 = vmatpush.msra.mxu2 %v181_v58  ;;  %v632_v29 = vld [vmem:[#allocation2 + $0x1c0] sm:$0xff]  ;;  %v229_v38 = vld [vmem:[#allocation2 + $0x48] sm:$0xff]  ;;  %v975_v43 = vld [vmem:[%s1693_s4 + $0x80] sm:$0xff] }
  0x21   :  { %131 = vmatpush.msra.mxu0 %v81_v30  ;;  %271 = vmatpush.msra.mxu3 %v220_v26  ;;  %v245_v30 = vld [vmem:[#allocation2 + $0xc8] sm:$0xff]  ;;  %v976_v39 = vld [vmem:[%s1693_s4 + $0x88] sm:$0xff]  ;;  %v1425_v45 = vld [vmem:[%s1695_s6 + $0x4] sm:$0xf] }
  0x22   :  { %151 = vmatpush.msra.mxu1 %v97_v31  ;;  %197 = vmatpush.msra.mxu2 %v180_v62  ;;  %v978_v31 = vld [vmem:[%s1693_s4 + $0x98] sm:$0xff]  ;;  %v1009_v58 = vld [vmem:[%s1691_s2 + $0x1] ss:$0 sm:$0xff]  ;;  %v224_v18 = vld [vmem:[#allocation2 + $0x20] sm:$0xff]  ;;  %vm595_vm7 = vcmp.ne.f32.partialorder %v1425_v45, 0.0 }
  0x23   :  { %132 = vmatpush.msra.mxu0 %v80_v32  ;;  %288 = vmatpush.msrb.mxu3 %v245_v30  ;;  %v633_v32 = vld [vmem:[#allocation2 + $0x1c8] sm:$0xff]  ;;  %v238_v54 = vld [vmem:[#allocation2 + $0x90] sm:$0xff]  ;;  %v227_v22 = vld [vmem:[#allocation2 + $0x38] sm:$0xff] }
  0x24   :  { %152 = vmatpush.msra.mxu1 %v96_v33  ;;  %198 = vmatpush.msra.mxu2 %v179_v1  ;;  %v624_v33 = vld [vmem:[#allocation2 + $0x180] sm:$0xff]  ;;  %v222_v62 = vld [vmem:[#allocation2 + $0x10] sm:$0xff]  ;;  %v613_v30 = vld [vmem:[#allocation2 + $0x128] sm:$0xff] }
  0x25   :  { %133 = vmatpush.msra.mxu0 %v79_v34  ;;  %v237_v34 = vld [vmem:[#allocation2 + $0x88] sm:$0xff]  ;;  %v612_v1 = vld [vmem:[#allocation2 + $0x120] sm:$0xff]  ;;  %v610_v26 = vld [vmem:[#allocation2 + $0x110] sm:$0xff] }
  0x26   :  { %153 = vmatpush.msra.mxu1 %v95_v35  ;;  %199 = vmatpush.msra.mxu2 %v178_v4  ;;  %v977_v35 = vld [vmem:[%s1693_s4 + $0x90] sm:$0xff]  ;;  %v639_v4 = vld [vmem:[#allocation2 + $0x1f8] sm:$0xff] }
  0x27   :  { %575 = vmatpush.msrb.mxu0 %v990_v41  ;;  %289 = vmatpush.msrb.mxu3 %v237_v34  ;;  %v608_v41 = vld [vmem:[#allocation2 + $0x100] sm:$0xff]  ;;  %v1011_v34 = vld [vmem:[%s1694_s5 + $0x1] ss:$0 sm:$0xff] }
  0x28   :  { %368 = vmatpush.msrb.mxu1 %v249_v49  ;;  %200 = vmatpush.msra.mxu2 %v177_v6  ;;  %v630_v6 = vld [vmem:[#allocation2 + $0x1b0] sm:$0xff] }
  0x29   :  { %576 = vmatpush.msrb.mxu0 %v989_v42  ;;  %v221_v42 = vld [vmem:[#allocation2 + $0x8] sm:$0xff]  ;;  %290 = vmatpush.msrb.mxu3 %v229_v38 }
  0x2a   :  { %369 = vmatpush.msrb.mxu1 %v241_v52  ;;  %201 = vmatpush.msra.mxu2 %v176_v9  ;;  %v635_v52 = vld [vmem:[#allocation2 + $0x1d8] sm:$0xff]  ;;  %v622_v9 = vld [vmem:[#allocation2 + $0x170] sm:$0xff] }
  0x2b   :  { %577 = vmatpush.msrb.mxu0 %v988_v44  ;;  %v609_v44 = vld [vmem:[#allocation2 + $0x108] sm:$0xff]  ;;  %291 = vmatpush.msrb.mxu3 %v221_v42 }
  0x2c   :  { %202 = vmatpush.msra.mxu2 %v175_v11  ;;  %370 = vmatpush.msrb.mxu1 %v233_v21  ;;  %v223_v11 = vld [vmem:[#allocation2 + $0x18] sm:$0xff] }
  0x2d   :  { %578 = vmatpush.msrb.mxu0 %v987_v47  ;;  %v235_v21 = vld [vmem:[#allocation2 + $0x78] sm:$0xff] }
  0x2e   :  { %203 = vmatpush.msra.mxu2 %v174_v12  ;;  %371 = vmatpush.msrb.mxu1 %v225_v25  ;;  %v614_v12 = vld [vmem:[#allocation2 + $0x130] sm:$0xff] }
  0x2f   :  { %579 = vmatpush.msrb.mxu0 %v986_v51  ;;  %v246_v51 = vld [vmem:[#allocation2 + $0xd0] sm:$0xff] }
  0x30   :  { %204 = vmatpush.msra.mxu2 %v173_v13  ;;  %v615_v13 = vld [vmem:[#allocation2 + $0x138] sm:$0xff]  ;;  %v618_v25 = vld [vmem:[#allocation2 + $0x150] sm:$0xff] }
  0x31   :  { %580 = vmatpush.msrb.mxu0 %v985_v55  ;;  %205 = vmatmul.f32.vlgmr.msra.gmra.mxu2 %v1398_v14  ;;  %v627_v55 = vld [vmem:[#allocation2 + $0x198] sm:$0xff] }
  0x32   :  { %388 = vmatpush.msrb.mxu2 %v250_v15  ;;  %v248_v15 = vld [vmem:[#allocation2 + $0xe0] sm:$0xff]  ;;  %v172_v14 = vld [vmem:[%s1696_s7] sm:$0xf] }
  0x33   :  { %581 = vmatpush.msrb.mxu0 %v984_v60  ;;  %v619_v60 = vld [vmem:[#allocation2 + $0x158] sm:$0xff]  ;;  %vm217_vm8 = vcmp.eq.f32.partialorder %v172_v14, inf  ;;  %vm216_vm10 = vcmp.eq.f32.partialorder %v172_v14, -inf }
  0x34   :  { %389 = vmatpush.msrb.mxu2 %v242_v19  ;;  %v251_v19 = vld [vmem:[#allocation2 + $0xf8] sm:$0xff] }
  0x35   :  { %582 = vmatpush.msrb.mxu0 %v983_v0  ;;  %v611_v0 = vld [vmem:[#allocation2 + $0x118] sm:$0xff] }
  0x36   :  { %390 = vmatpush.msrb.mxu2 %v234_v23  ;;  %v634_v23 = vld [vmem:[#allocation2 + $0x1d0] sm:$0xff] }
  0x37   :  { %583 = vmatpush.msrb.mxu0 %v982_v2  ;;  %v247_v2 = vld [vmem:[#allocation2 + $0xd8] sm:$0xff] }
  0x38   :  { %391 = vmatpush.msrb.mxu2 %v226_v27  ;;  %v637_v27 = vld [vmem:[#allocation2 + $0x1e8] sm:$0xff] }
  0x39   :  { %584 = vmatpush.msrb.mxu0 %v981_v20  ;;  %v243_v20 = vld [vmem:[#allocation2 + $0xb8] sm:$0xff] }
  0x3a   :  { %675 = vmatpush.msra.mxu2 %v633_v32  ;;  %v1010_v32 = vld [vmem:[%s1694_s5] ss:$0 sm:$0xff] }
  0x3b   :  { %585 = vmatpush.msrb.mxu0 %v980_v24  ;;  %v626_v24 = vld [vmem:[#allocation2 + $0x190] sm:$0xff] }
  0x3c   :  { %676 = vmatpush.msra.mxu2 %v625_v36 }
  0x3d   :  { %586 = vmatpush.msrb.mxu0 %v979_v28  ;;  %v629_v28 = vld [vmem:[#allocation2 + $0x1a8] sm:$0xff] }
  0x3f   :  { %587 = vmatpush.msrb.mxu0 %v978_v31 }
  0x41   :  { %588 = vmatpush.msrb.mxu0 %v977_v35  ;;  %v214_v35 = vsel %vm209_vm6, 0.05, %v1010_v32 }
  0x43   :  { %589 = vmatpush.msrb.mxu0 %v976_v39 }
  0x45   :  { %590 = vmatpush.msrb.mxu0 %v975_v43 }
  0x7a   :  { %v54_v53 = vpop.permute.xlu0 %53 }
  0x7b   :  { %vm58_vm0 = vcmp.eq.s32.totalorder %v50_v40, %v54_v53  ;;  %vm59_vm1 = vcmp.eq.s32.totalorder %v51_v46, %v54_v53  ;;  %v636_v53 = vld [vmem:[#allocation2 + $0x1e0] sm:$0xff] }
  0x7c   :  { %v962_v57 = vsel %vm59_vm1, 1.0, %v1164_v56  ;;  %v961_v61 = vsel %vm58_vm0, 1.0, %v1164_v56 }
  0x7d   :  { %v74_v59 = vrot.slane %v962_v57, 4 }
  0x7f   :  { %v77_v63 = vsel %vm76_vm2, %v961_v61, %v74_v59  ;;  %v230_v59 = vld [vmem:[#allocation2 + $0x50] sm:$0xff]  ;;  %v620_v61 = vld [vmem:[#allocation2 + $0x160] sm:$0xff] }
  0x80   :  { %111 = vst [vmem:[#allocation1] ss:$2 sm:$0xff] %v77_v63 }
  0x82   :  { %v57_v3 = vpop.permute.xlu0 %56 }
  0x83   :  { %vm60_vm3 = vcmp.eq.s32.totalorder %v50_v40, %v57_v3  ;;  %vm61_vm4 = vcmp.eq.s32.totalorder %v51_v46, %v57_v3  ;;  %v617_v40 = vld [vmem:[#allocation2 + $0x148] sm:$0xff]  ;;  %v1008_v46 = vld [vmem:[%s1691_s2] ss:$0 sm:$0xff]  ;;  %v638_v3 = vld [vmem:[#allocation2 + $0x1f0] sm:$0xff] }
  0x84   :  { %v964_v5 = vsel %vm61_vm4, 1.0, %v1164_v56  ;;  %v963_v8 = vsel %vm60_vm3, 1.0, %v1164_v56  ;;  %677 = vmatpush.msra.mxu2 %v617_v40  ;;  %v628_v56 = vld [vmem:[#allocation2 + $0x1a0] sm:$0xff] }
  0x85   :  { %v75_v7 = vrot.slane %v964_v5, 4  ;;  %v239_v5 = vld [vmem:[#allocation2 + $0x98] sm:$0xff] }
  0x86   :  { %678 = vmatpush.msra.mxu2 %v609_v44 }
  0x87   :  { %v78_v10 = vsel %vm76_vm2, %v963_v8, %v75_v7  ;;  %v631_v7 = vld [vmem:[#allocation2 + $0x1b8] sm:$0xff] }
  0x88   :  { %113 = vst [vmem:[#allocation1 + $0x1] ss:$2 sm:$0xff] %v78_v10  ;;  %v231_v8 = vld [vmem:[#allocation2 + $0x58] sm:$0xff] }
  0x89   :  { %v623_v10 = vld [vmem:[#allocation2 + $0x178] sm:$0xff] }
  0x8f   :  { %v114_v16 = vld.sshfl [vmem:[#allocation1] sm:$0xff pattern:$0x75316420]  ;;  %v115_v17 = vld.sshfl [vmem:[#allocation1 + $0x8] sm:$0xff pattern:$0x75316420] }
  0x90   :  { %134 = vmatmul.f32.vlgmr.msra.gmra.mxu0 %v114_v16  ;;  %154 = vmatmul.f32.vlgmr.msra.gmra.mxu1 %v115_v17  ;;  %v240_v16 = vld [vmem:[#allocation2 + $0xa0] sm:$0xff] }
  0x91   :  { %655 = vmatpush.msra.mxu1 %v632_v29  ;;  %v232_v17 = vld [vmem:[#allocation2 + $0x60] sm:$0xff]  ;;  %v621_v29 = vld [vmem:[#allocation2 + $0x168] sm:$0xff] }
  0x93   :  { %656 = vmatpush.msra.mxu1 %v624_v33 }
  0x95   :  { %657 = vmatpush.msra.mxu1 %v616_v37  ;;  %v601_v37 = vsel %vm595_vm7, 0.05, %v1011_v34 }
  0x97   :  { %658 = vmatpush.msra.mxu1 %v608_v41 }
  0x98   :  { %591 = vmatmul.f32.vlgmr.msrb.gmra.mxu0 %v1425_v45  ;;  %v974_v45 = vld [vmem:[%s1696_s7 + $0x4] sm:$0xf]  ;;  %s1165_s7 = smov [#allocation5]  }
  0x99   :  { %vm604_vm9 = vcmp.eq.f32.partialorder %v974_v45, inf  ;;  %vm603_vm11 = vcmp.eq.f32.partialorder %v974_v45, -inf  ;;  %s946_s15 = sshll.u32 %s1165_s7, 4  ;;  %s947_s15 = int_to_ptr.vmem [resolvable:$true] %s946_s15 }
  0xb4   :  { %v206_v31 = vpop.f32.mrf.mxu2 }
  0xb5   :  { %v1478_v39 = vmul.f32 %v214_v35, %v206_v31 }
 0x10d   :  { %v135_v47 = vpop.f32.mrf.mxu0  ;;  %v155_v48 = vpop.f32.mrf.mxu1 }
 0x10e   :  { %v156_v49 = vadd.f32 %v155_v48, %v135_v47 }
 0x110   :  { %v1431_v50 = vadd.f32 %v1008_v46, %v156_v49  ;;  %v159_v57 = vrot.slane %v156_v49, 4 }
 0x112   :  { %965 = vmatmul.msk.f32.vlgmr.msra.gmra.mxu3 %vm252_vm5, %v1431_v50  ;;  %970 = vmatmul.msk.f32.vlgmr.msrb.gmra.mxu1 %vm252_vm5, %v1431_v50  ;;  %v1442_v63 = vadd.f32 %v1009_v58, %v159_v57 }
 0x113   :  { %971 = vmatmul.msk.f32.vlgmr.msrb.gmra.mxu2 %vm252_vm5, %v1431_v50  ;;  %308 = vmatpush.msra.mxu3 %v246_v51 }
 0x114   :  { %715 = vmatpush.msrb.mxu1 %v635_v52  ;;  %735 = vmatpush.msrb.mxu2 %v636_v53  ;;  %v218_v52 = vsel %vm217_vm8, 1e+08, %v172_v14 }
 0x115   :  { %309 = vmatpush.msra.mxu3 %v238_v54  ;;  %v592_v36 = vpop.f32.mrf.mxu0 }
 0x116   :  { %716 = vmatpush.msrb.mxu1 %v627_v55  ;;  %736 = vmatpush.msrb.mxu2 %v628_v56  ;;  %v1480_v42 = vmul.f32 %v601_v37, %v592_v36  ;;  %v605_v55 = vsel %vm604_vm9, 1e+08, %v974_v45 }
 0x117   :  { %310 = vmatpush.msra.mxu3 %v230_v59 }
 0x118   :  { %717 = vmatpush.msrb.mxu1 %v619_v60  ;;  %737 = vmatpush.msrb.mxu2 %v620_v61  ;;  %v1492_v60 = vsel %vm216_vm10, -1e+08, %v218_v52 }
 0x119   :  { %311 = vmatpush.msra.mxu3 %v222_v62 }
 0x11a   :  { %966 = vmatmul.msk.f32.vlgmr.msrb.gmra.mxu3 %vm252_vm5, %v1431_v50  ;;  %992 = vmatmul.msk.f32.vlgmr.msra.gmra.mxu1 %vm252_vm5, %v1442_v63 }
 0x11b   :  { %993 = vmatmul.msk.f32.vlgmr.msra.gmra.mxu2 %vm252_vm5, %v1442_v63  ;;  %718 = vmatpush.msrb.mxu1 %v611_v0 }
 0x11c   :  { %738 = vmatpush.msrb.mxu2 %v612_v1  ;;  %328 = vmatpush.msrb.mxu3 %v247_v2  ;;  %v1496_v1 = vsel %vm603_vm11, -1e+08, %v605_v55 }
 0x11d   :  { %775 = vmatpush.msra.mxu1 %v638_v3 }
 0x11e   :  { %795 = vmatpush.msra.mxu2 %v639_v4  ;;  %329 = vmatpush.msrb.mxu3 %v239_v5 }
 0x11f   :  { %776 = vmatpush.msra.mxu1 %v630_v6 }
 0x120   :  { %796 = vmatpush.msra.mxu2 %v631_v7  ;;  %330 = vmatpush.msrb.mxu3 %v231_v8 }
 0x121   :  { %777 = vmatpush.msra.mxu1 %v622_v9 }
 0x122   :  { %797 = vmatpush.msra.mxu2 %v623_v10  ;;  %967 = vmatmul.msk.f32.vlgmr.msra.gmra.mxu3 %vm252_vm5, %v1431_v50 }
 0x123   :  { %995 = vmatmul.msk.f32.vlgmr.msrb.gmra.mxu1 %vm252_vm5, %v1442_v63  ;;  %996 = vmatmul.msk.f32.vlgmr.msrb.gmra.mxu2 %vm252_vm5, %v1442_v63 }
 0x124   :  { %331 = vmatpush.msrb.mxu3 %v223_v11  ;;  %778 = vmatpush.msra.mxu1 %v614_v12 }
 0x125   :  { %798 = vmatpush.msra.mxu2 %v615_v13 }
 0x126   :  { %348 = vmatpush.msra.mxu3 %v248_v15 }
 0x128   :  { %349 = vmatpush.msra.mxu3 %v240_v16 }
 0x12a   :  { %350 = vmatpush.msra.mxu3 %v232_v17 }
 0x12b   :  { %968 = vmatmul.msk.f32.vlgmr.msrb.gmra.mxu3 %vm252_vm5, %v1431_v50  ;;  %998 = vmatmul.msk.f32.vlgmr.msra.gmra.mxu1 %vm252_vm5, %v1442_v63 }
 0x12c   :  { %999 = vmatmul.msk.f32.vlgmr.msra.gmra.mxu2 %vm252_vm5, %v1442_v63  ;;  %351 = vmatpush.msra.mxu3 %v224_v18 }
 0x12e   :  { %408 = vmatpush.msrb.mxu3 %v251_v19 }
 0x130   :  { %409 = vmatpush.msrb.mxu3 %v243_v20 }
 0x132   :  { %410 = vmatpush.msrb.mxu3 %v235_v21 }
 0x133   :  { %969 = vmatmul.msk.f32.vlgmr.msra.gmra.mxu3 %vm252_vm5, %v1431_v50 }
 0x134   :  { %411 = vmatpush.msrb.mxu3 %v227_v22 }
 0x136   :  { %695 = vmatpush.msra.mxu3 %v634_v23 }
 0x138   :  { %696 = vmatpush.msra.mxu3 %v626_v24 }
 0x13a   :  { %697 = vmatpush.msra.mxu3 %v618_v25 }
 0x13b   :  { %972 = vmatmul.msk.f32.vlgmr.msrb.gmra.mxu3 %vm252_vm5, %v1431_v50 }
 0x13c   :  { %698 = vmatpush.msra.mxu3 %v610_v26 }
 0x13e   :  { %755 = vmatpush.msrb.mxu3 %v637_v27 }
 0x140   :  { %756 = vmatpush.msrb.mxu3 %v629_v28 }
 0x142   :  { %757 = vmatpush.msrb.mxu3 %v621_v29 }
 0x143   :  { %994 = vmatmul.msk.f32.vlgmr.msra.gmra.mxu3 %vm252_vm5, %v1442_v63 }
 0x144   :  { %758 = vmatpush.msrb.mxu3 %v613_v30 }
 0x14b   :  { %997 = vmatmul.msk.f32.vlgmr.msrb.gmra.mxu3 %vm252_vm5, %v1442_v63 }
 0x18f   :  { %v373_v33 = vpop.f32.mrf.mxu1 }
 0x190   :  { %v501_v49 = vmul.f32 0.17677669, %v373_v33 }
 0x192   :  { %v502_v63 = vsub.f32 %v501_v49, %v1478_v39 }
 0x195   :  { %v273_v38 = vpop.f32.mrf.mxu3 }
 0x196   :  { %v416_v40 = vmul.f32 0.17677669, %v273_v38  ;;  %v393_v41 = vpop.f32.mrf.mxu2 }
 0x197   :  { %v660_v43 = vpop.f32.mrf.mxu1  ;;  %v518_v7 = vmul.f32 0.17677669, %v393_v41 }
 0x198   :  { %v417_v44 = vsub.f32 %v416_v40, %v1478_v39  ;;  %v803_v46 = vmul.f32 0.17677669, %v660_v43 }
 0x199   :  { %v519_v20 = vsub.f32 %v518_v7, %v1478_v39 }
 0x19a   :  { %1012 = vtanh.f32 %v417_v44  ;;  %v804_v47 = vsub.f32 %v803_v46, %v1480_v42 }
 0x19c   :  { %1014 = vtanh.f32 %v804_v47 }
 0x19d   :  { %v293_v48 = vpop.f32.mrf.mxu3 }
 0x19e   :  { %v433_v50 = vmul.f32 0.17677669, %v293_v48  ;;  %v680_v51 = vpop.f32.mrf.mxu2 }
 0x19f   :  { %v820_v53 = vmul.f32 0.17677669, %v680_v51 }
 0x1a0   :  { %v720_v54 = vpop.f32.mrf.mxu1  ;;  %v1013_v56 = vpop.eup %1012  ;;  %v434_v57 = vsub.f32 %v433_v50, %v1478_v39 }
 0x1a1   :  { %v854_v58 = vmul.f32 0.17677669, %v720_v54  ;;  %v821_v59 = vsub.f32 %v820_v53, %v1480_v42  ;;  %v419_v61 = vmul.f32 50.0, %v1013_v56 }
 0x1a2   :  { %v1015_v62 = vpop.eup %1014  ;;  %1016 = vtanh.f32 %v434_v57 }
 0x1a3   :  { %v855_v0 = vsub.f32 %v854_v58, %v1480_v42  ;;  %1018 = vtanh.f32 %v821_v59  ;;  %v1499_v2 = vadd.f32 %v419_v61, %v1492_v60  ;;  %v806_v3 = vmul.f32 50.0, %v1015_v62 }
 0x1a5   :  { %1020 = vtanh.f32 %v855_v0  ;;  %v313_v4 = vpop.f32.mrf.mxu3  ;;  %v421_v5 = vsel %vm76_vm2, %v1499_v2, -inf  ;;  %v1504_v6 = vadd.f32 %v806_v3, %v1496_v1 }
 0x1a6   :  { %1022 = vtanh.f32 %v502_v63  ;;  %v450_v8 = vmul.f32 0.17677669, %v313_v4  ;;  %v740_v9 = vpop.f32.mrf.mxu2  ;;  %422 = vmax.xlane.f32.xlu1 %v421_v5 }
 0x1a7   :  { %v871_v10 = vmul.f32 0.17677669, %v740_v9  ;;  %v808_v11 = vsel %vm76_vm2, %v1504_v6, -inf }
 0x1a8   :  { %v1017_v12 = vpop.eup %1016  ;;  %v451_v13 = vsub.f32 %v450_v8, %v1478_v39  ;;  %809 = vmax.xlane.f32.xlu2 %v808_v11  ;;  %v780_v17 = vpop.f32.mrf.mxu1 }
 0x1a9   :  { %v1019_v15 = vpop.eup %1018  ;;  %v872_v16 = vsub.f32 %v871_v10, %v1480_v42  ;;  %v436_v18 = vmul.f32 50.0, %v1017_v12  ;;  %v905_v24 = vmul.f32 0.17677669, %v780_v17 }
 0x1aa   :  { %1024 = vtanh.f32 %v451_v13  ;;  %v823_v21 = vmul.f32 50.0, %v1019_v15 }
 0x1ab   :  { %v1021_v19 = vpop.eup %1020  ;;  %v1512_v22 = vadd.f32 %v436_v18, %v1492_v60  ;;  %1026 = vtanh.f32 %v872_v16  ;;  %v906_v33 = vsub.f32 %v905_v24, %v1480_v42 }
 0x1ac   :  { %v1023_v23 = vpop.eup %1022  ;;  %v1515_v25 = vadd.f32 %v823_v21, %v1496_v1  ;;  %v857_v28 = vmul.f32 50.0, %v1021_v19  ;;  %1028 = vtanh.f32 %v519_v20 }
 0x1ad   :  { %v438_v27 = vsel %vm76_vm2, %v1512_v22, -inf  ;;  %v504_v31 = vmul.f32 50.0, %v1023_v23  ;;  %1030 = vtanh.f32 %v906_v33 }
 0x1ae   :  { %v333_v26 = vpop.f32.mrf.mxu3  ;;  %439 = vmax.xlane.f32.xlu1 %v438_v27  ;;  %v825_v30 = vsel %vm76_vm2, %v1515_v25, -inf  ;;  %v1523_v35 = vadd.f32 %v857_v28, %v1496_v1 }
 0x1af   :  { %v467_v29 = vmul.f32 0.17677669, %v333_v26  ;;  %v1530_v40 = vadd.f32 %v504_v31, %v1492_v60  ;;  %v800_v10 = vpop.f32.mrf.mxu2 }
 0x1b0   :  { %v1025_v32 = vpop.eup %1024  ;;  %826 = vmax.xlane.f32.xlu2 %v825_v30  ;;  %v859_v46 = vsel %vm76_vm2, %v1523_v35, -inf  ;;  %v922_v12 = vmul.f32 0.17677669, %v800_v10 }
 0x1b1   :  { %v453_v34 = vmul.f32 50.0, %v1025_v32  ;;  %v1027_v36 = vpop.eup %1026  ;;  %v468_v37 = vsub.f32 %v467_v29, %v1478_v39  ;;  %v506_v47 = vsel %vm76_vm2, %v1530_v40, -inf }
 0x1b2   :  { %v1029_v41 = vpop.eup %1028  ;;  %v874_v14 = vmul.f32 50.0, %v1027_v36  ;;  %v923_v19 = vsub.f32 %v922_v12, %v1480_v42 }
 0x1b3   :  { %v1527_v38 = vadd.f32 %v453_v34, %v1492_v60  ;;  %1032 = vtanh.f32 %v468_v37  ;;  %v521_v48 = vmul.f32 50.0, %v1029_v41  ;;  %v1031_v50 = vpop.eup %1030 }
 0x1b4   :  { %v1539_v49 = vadd.f32 %v874_v14, %v1496_v1  ;;  %v908_v54 = vmul.f32 50.0, %v1031_v50 }
 0x1b5   :  { %v455_v44 = vsel %vm76_vm2, %v1527_v38, -inf  ;;  %v1543_v52 = vadd.f32 %v521_v48, %v1492_v60 }
 0x1b6   :  { %v353_v43 = vpop.f32.mrf.mxu3  ;;  %456 = vmax.xlane.f32.xlu0 %v455_v44  ;;  %860 = vmax.xlane.f32.xlu1 %v859_v46  ;;  %v876_v56 = vsel %vm76_vm2, %v1539_v49, -inf  ;;  %v1550_v61 = vadd.f32 %v908_v54, %v1496_v1 }
 0x1b7   :  { %v484_v45 = vmul.f32 0.17677669, %v353_v43  ;;  %v523_v58 = vsel %vm76_vm2, %v1543_v52, -inf }
 0x1b8   :  { %507 = vmax.xlane.f32.xlu2 %v506_v47  ;;  %v910_v4 = vsel %vm76_vm2, %v1550_v61, -inf }
 0x1b9   :  { %v485_v51 = vsub.f32 %v484_v45, %v1478_v39  ;;  %v1033_v53 = vpop.eup %1032 }
 0x1ba   :  { %v470_v59 = vmul.f32 50.0, %v1033_v53 }
 0x1bb   :  { %1034 = vtanh.f32 %v485_v51 }
 0x1bc   :  { %v1554_v63 = vadd.f32 %v470_v59, %v1492_v60 }
 0x1be   :  { %v413_v55 = vpop.f32.mrf.mxu3  ;;  %877 = vmax.xlane.f32.xlu1 %v876_v56  ;;  %v472_v7 = vsel %vm76_vm2, %v1554_v63, -inf }
 0x1bf   :  { %v535_v57 = vmul.f32 0.17677669, %v413_v55 }
 0x1c0   :  { %524 = vmax.xlane.f32.xlu2 %v523_v58 }
 0x1c1   :  { %v536_v62 = vsub.f32 %v535_v57, %v1478_v39  ;;  %v1035_v0 = vpop.eup %1034 }
 0x1c2   :  { %v487_v8 = vmul.f32 50.0, %v1035_v0 }
 0x1c3   :  { %1036 = vtanh.f32 %v536_v62 }
 0x1c4   :  { %v1562_v39 = vadd.f32 %v487_v8, %v1492_v60 }
 0x1c6   :  { %v700_v3 = vpop.f32.mrf.mxu3  ;;  %911 = vmax.xlane.f32.xlu1 %v910_v4  ;;  %v489_v16 = vsel %vm76_vm2, %v1562_v39, -inf }
 0x1c7   :  { %v837_v5 = vmul.f32 0.17677669, %v700_v3 }
 0x1c8   :  { %473 = vmax.xlane.f32.xlu2 %v472_v7 }
 0x1c9   :  { %v838_v9 = vsub.f32 %v837_v5, %v1480_v42  ;;  %v1037_v11 = vpop.eup %1036 }
 0x1ca   :  { %v538_v17 = vmul.f32 50.0, %v1037_v11 }
 0x1cb   :  { %1038 = vtanh.f32 %v838_v9 }
 0x1cc   :  { %v1572_v24 = vadd.f32 %v538_v17, %v1492_v60 }
 0x1ce   :  { %v760_v13 = vpop.f32.mrf.mxu3  ;;  %v540_v27 = vsel %vm76_vm2, %v1572_v24, -inf }
 0x1cf   :  { %v888_v15 = vmul.f32 0.17677669, %v760_v13 }
 0x1d0   :  { %490 = vmax.xlane.f32.xlu2 %v489_v16 }
 0x1d1   :  { %v1039_v18 = vpop.eup %1038  ;;  %v889_v20 = vsub.f32 %v888_v15, %v1480_v42 }
 0x1d2   :  { %v840_v21 = vmul.f32 50.0, %v1039_v18 }
 0x1d3   :  { %1040 = vtanh.f32 %v889_v20 }
 0x1d4   :  { %v1569_v23 = vadd.f32 %v840_v21, %v1496_v1  ;;  %1042 = vtanh.f32 %v923_v19 }
 0x1d6   :  { %v842_v26 = vsel %vm76_vm2, %v1569_v23, -inf }
 0x1d7   :  { %843 = vmax.xlane.f32.xlu1 %v842_v26 }
 0x1d8   :  { %541 = vmax.xlane.f32.xlu2 %v540_v27 }
 0x1d9   :  { %v1041_v28 = vpop.eup %1040 }
 0x1da   :  { %v891_v42 = vmul.f32 50.0, %v1041_v28  ;;  %v1043_v29 = vpop.eup %1042 }
 0x1db   :  { %v925_v31 = vmul.f32 50.0, %v1043_v29 }
 0x1dc   :  { %v1579_v30 = vadd.f32 %v891_v42, %v1496_v1 }
 0x1dd   :  { %v1584_v32 = vadd.f32 %v925_v31, %v1496_v1 }
 0x1de   :  { %v893_v60 = vsel %vm76_vm2, %v1579_v30, -inf }
 0x1df   :  { %894 = vmax.xlane.f32.xlu1 %v893_v60  ;;  %v927_v33 = vsel %vm76_vm2, %v1584_v32, -inf }
 0x1e7   :  { %928 = vmax.xlane.f32.xlu1 %v927_v33 }
 0x219   :  { %v423_v34 = vpop.xlane.xlu1 %422 }
 0x21a   :  { %v424_v36 = vsub.f32 %v1499_v2, %v423_v34 }
 0x21b   :  { %v810_v37 = vpop.xlane.xlu2 %809 }
 0x21c   :  { %v425_v41 = vmul.f32 1.442695, %v424_v36  ;;  %v811_v43 = vsub.f32 %v1504_v6, %v810_v37 }
 0x21e   :  { %1044 = vpow2.f32 %v425_v41  ;;  %v812_v44 = vmul.f32 1.442695, %v811_v43 }
 0x220   :  { %1046 = vpow2.f32 %v812_v44 }
 0x221   :  { %v440_v46 = vpop.xlane.xlu1 %439 }
 0x222   :  { %v441_v51 = vsub.f32 %v1512_v22, %v440_v46 }
 0x223   :  { %v827_v14 = vpop.xlane.xlu2 %826 }
 0x224   :  { %v1590_v45 = vpop.eup %1044  ;;  %v442_v54 = vmul.f32 1.442695, %v441_v51  ;;  %v828_v57 = vsub.f32 %v1515_v25, %v827_v14 }
 0x225   :  { %v427_v1 = vsel %vm76_vm2, %v1590_v45, 0.0 }
 0x226   :  { %v1594_v47 = vpop.eup %1046  ;;  %428 = vadd.xlane.f32.xlu2 %v427_v1  ;;  %v829_v22 = vmul.f32 1.442695, %v828_v57 }
 0x227   :  { %v814_v2 = vsel %vm76_vm2, %v1594_v47, 0.0 }
 0x228   :  { %815 = vadd.xlane.f32.xlu1 %v814_v2 }
 0x229   :  { %v861_v50 = vpop.xlane.xlu1 %860  ;;  %v457_v3 = vpop.xlane.xlu0 %456 }
 0x22a   :  { %v862_v59 = vsub.f32 %v1523_v35, %v861_v50  ;;  %v458_v25 = vsub.f32 %v1527_v38, %v457_v3 }
 0x22b   :  { %v508_v48 = vpop.xlane.xlu2 %507 }
 0x22c   :  { %v509_v6 = vsub.f32 %v1530_v40, %v508_v48  ;;  %v863_v4 = vmul.f32 1.442695, %v862_v59  ;;  %v459_v10 = vmul.f32 1.442695, %v458_v25 }
 0x22e   :  { %v510_v53 = vmul.f32 1.442695, %v509_v6 }
 0x230   :  { %1048 = vpow2.f32 %v510_v53 }
 0x231   :  { %1050 = vpow2.f32 %v442_v54  ;;  %v878_v0 = vpop.xlane.xlu1 %877 }
 0x232   :  { %v879_v35 = vsub.f32 %v1539_v49, %v878_v0 }
 0x233   :  { %v525_v55 = vpop.xlane.xlu2 %524 }
 0x234   :  { %v526_v56 = vsub.f32 %v1543_v52, %v525_v55  ;;  %v880_v12 = vmul.f32 1.442695, %v879_v35 }
 0x236   :  { %v1602_v58 = vpop.eup %1048  ;;  %v527_v62 = vmul.f32 1.442695, %v526_v56 }
 0x237   :  { %v512_v40 = vsel %vm76_vm2, %v1602_v58, 0.0  ;;  %v1607_v7 = vpop.eup %1050 }
 0x238   :  { %1052 = vpow2.f32 %v527_v62  ;;  %513 = vadd.xlane.f32.xlu0 %v512_v40  ;;  %v444_v8 = vsel %vm76_vm2, %v1607_v7, 0.0 }
 0x239   :  { %1054 = vpow2.f32 %v829_v22  ;;  %v912_v11 = vpop.xlane.xlu1 %911 }
 0x23a   :  { %1056 = vpow2.f32 %v863_v4  ;;  %v913_v49 = vsub.f32 %v1550_v61, %v912_v11 }
 0x23b   :  { %v474_v5 = vpop.xlane.xlu2 %473  ;;  %1058 = vpow2.f32 %v459_v10 }
 0x23c   :  { %1060 = vpow2.f32 %v880_v12  ;;  %v475_v17 = vsub.f32 %v1554_v63, %v474_v5  ;;  %v914_v21 = vmul.f32 1.442695, %v913_v49 }
 0x23e   :  { %v1610_v52 = vpop.eup %1052  ;;  %v476_v27 = vmul.f32 1.442695, %v475_v17 }
 0x23f   :  { %v529_v9 = vsel %vm76_vm2, %v1610_v52, 0.0  ;;  %v1617_v13 = vpop.eup %1054 }
 0x240   :  { %445 = vadd.xlane.f32.xlu0 %v444_v8  ;;  %530 = vadd.xlane.f32.xlu2 %v529_v9  ;;  %v1619_v38 = vpop.eup %1056  ;;  %v831_v19 = vsel %vm76_vm2, %v1617_v13, 0.0 }
 0x241   :  { %v865_v20 = vsel %vm76_vm2, %v1619_v38, 0.0  ;;  %v1629_v28 = vpop.eup %1058 }
 0x242   :  { %v1631_v61 = vpop.eup %1060  ;;  %v461_v29 = vsel %vm76_vm2, %v1629_v28, 0.0 }
 0x243   :  { %v491_v15 = vpop.xlane.xlu2 %490  ;;  %v882_v31 = vsel %vm76_vm2, %v1631_v61, 0.0 }
 0x244   :  { %v492_v16 = vsub.f32 %v1562_v39, %v491_v15 }
 0x246   :  { %v493_v18 = vmul.f32 1.442695, %v492_v16 }
 0x248   :  { %1062 = vpow2.f32 %v493_v18  ;;  %832 = vadd.xlane.f32.xlu2 %v831_v19  ;;  %866 = vadd.xlane.f32.xlu0 %v865_v20 }
 0x249   :  { %1064 = vpow2.f32 %v914_v21 }
 0x24a   :  { %v844_v26 = vpop.xlane.xlu1 %843  ;;  %1066 = vpow2.f32 %v476_v27 }
 0x24b   :  { %v845_v39 = vsub.f32 %v1569_v23, %v844_v26  ;;  %v542_v37 = vpop.xlane.xlu2 %541 }
 0x24c   :  { %v543_v44 = vsub.f32 %v1572_v24, %v542_v37 }
 0x24d   :  { %v846_v63 = vmul.f32 1.442695, %v845_v39 }
 0x24e   :  { %v1633_v42 = vpop.eup %1062  ;;  %v544_v48 = vmul.f32 1.442695, %v543_v44 }
 0x24f   :  { %1068 = vpow2.f32 %v846_v63  ;;  %v495_v60 = vsel %vm76_vm2, %v1633_v42, 0.0  ;;  %v1642_v34 = vpop.eup %1064 }
 0x250   :  { %462 = vadd.xlane.f32.xlu0 %v461_v29  ;;  %883 = vadd.xlane.f32.xlu2 %v882_v31  ;;  %v1644_v36 = vpop.eup %1066  ;;  %v916_v14 = vsel %vm76_vm2, %v1642_v34, 0.0 }
 0x251   :  { %496 = vadd.xlane.f32.xlu1 %v495_v60  ;;  %v478_v46 = vsel %vm76_vm2, %v1644_v36, 0.0 }
 0x252   :  { %v895_v23 = vpop.xlane.xlu1 %894 }
 0x253   :  { %v896_v33 = vsub.f32 %v1579_v30, %v895_v23 }
 0x255   :  { %v897_v41 = vmul.f32 1.442695, %v896_v33  ;;  %v1646_v43 = vpop.eup %1068 }
 0x256   :  { %v848_v30 = vsel %vm76_vm2, %v1646_v43, 0.0 }
 0x257   :  { %1070 = vpow2.f32 %v897_v41 }
 0x258   :  { %479 = vadd.xlane.f32.xlu2 %v478_v46  ;;  %917 = vadd.xlane.f32.xlu0 %v916_v14 }
 0x259   :  { %849 = vadd.xlane.f32.xlu1 %v848_v30 }
 0x25a   :  { %v929_v1 = vpop.xlane.xlu1 %928 }
 0x25b   :  { %v930_v2 = vsub.f32 %v1584_v32, %v929_v1 }
 0x25d   :  { %v931_v6 = vmul.f32 1.442695, %v930_v2  ;;  %v1656_v50 = vpop.eup %1070 }
 0x25e   :  { %v899_v24 = vsel %vm76_vm2, %v1656_v50, 0.0 }
 0x25f   :  { %1072 = vpow2.f32 %v931_v6 }
 0x260   :  { %1074 = vpow2.f32 %v544_v48 }
 0x261   :  { %900 = vadd.xlane.f32.xlu1 %v899_v24 }
 0x265   :  { %v1660_v51 = vpop.eup %1072 }
 0x266   :  { %v1662_v53 = vpop.eup %1074  ;;  %v933_v54 = vsel %vm76_vm2, %v1660_v51, 0.0 }
 0x267   :  { %934 = vadd.xlane.f32.xlu2 %v933_v54  ;;  %v546_v32 = vsel %vm76_vm2, %v1662_v53, 0.0 }
 0x269   :  { %547 = vadd.xlane.f32.xlu1 %v546_v32 }
 0x299   :  { %v429_v55 = vpop.xlane.xlu2 %428 }
 0x29a   :  { %1076 = vrcp.f32 %v429_v55 }
 0x29b   :  { %v816_v0 = vpop.xlane.xlu1 %815 }
 0x2a0   :  { %v1077_v25 = vpop.eup %1076 }
 0x2a1   :  { %v431_v49 = vmul.f32 %v1077_v25, %v1590_v45 }
 0x2ab   :  { %v514_v56 = vpop.xlane.xlu0 %513 }
 0x2b3   :  { %v446_v57 = vpop.xlane.xlu0 %445  ;;  %v531_v59 = vpop.xlane.xlu2 %530 }
 0x2b4   :  { %1078 = vrcp.f32 %v446_v57 }
 0x2ba   :  { %v1079_v8 = vpop.eup %1078 }
 0x2bb   :  { %v833_v62 = vpop.xlane.xlu2 %832  ;;  %v867_v40 = vpop.xlane.xlu0 %866  ;;  %v448_v12 = vmul.f32 %v1079_v8, %v1607_v7 }
 0x2bc   :  { %1080 = vrcp.f32 %v833_v62 }
 0x2bd   :  { %v449_v26 = vadd.f32 %v448_v12, %v431_v49 }
 0x2c2   :  { %v1081_v9 = vpop.eup %1080 }
 0x2c3   :  { %v884_v22 = vpop.xlane.xlu2 %883  ;;  %v463_v4 = vpop.xlane.xlu0 %462  ;;  %v835_v15 = vmul.f32 %v1081_v9, %v1617_v13 }
 0x2c4   :  { %v497_v3 = vpop.xlane.xlu1 %496  ;;  %1082 = vrcp.f32 %v463_v4 }
 0x2c5   :  { %1084 = vrcp.f32 %v816_v0 }
 0x2ca   :  { %v1083_v10 = vpop.eup %1082 }
 0x2cb   :  { %v480_v5 = vpop.xlane.xlu2 %479  ;;  %v1085_v11 = vpop.eup %1084  ;;  %v465_v17 = vmul.f32 %v1083_v10, %v1629_v28 }
 0x2cc   :  { %1086 = vrcp.f32 %v480_v5  ;;  %v850_v35 = vpop.xlane.xlu1 %849  ;;  %v818_v19 = vmul.f32 %v1085_v11, %v1594_v47  ;;  %v918_v20 = vpop.xlane.xlu0 %917 }
 0x2cd   :  { %1088 = vrcp.f32 %v867_v40  ;;  %v466_v29 = vadd.f32 %v465_v17, %v449_v26 }
 0x2ce   :  { %1090 = vrcp.f32 %v850_v35  ;;  %v836_v7 = vadd.f32 %v835_v15, %v818_v19 }
 0x2cf   :  { %1092 = vrcp.f32 %v884_v22 }
 0x2d0   :  { %1094 = vrcp.f32 %v497_v3 }
 0x2d1   :  { %1096 = vrcp.f32 %v514_v56 }
 0x2d2   :  { %v1087_v16 = vpop.eup %1086 }
 0x2d3   :  { %v1089_v18 = vpop.eup %1088  ;;  %v482_v27 = vmul.f32 %v1087_v16, %v1644_v36 }
 0x2d4   :  { %v1091_v21 = vpop.eup %1090  ;;  %v901_v39 = vpop.xlane.xlu1 %900  ;;  %v869_v28 = vmul.f32 %v1089_v18, %v1619_v38 }
 0x2d5   :  { %v852_v63 = vmul.f32 %v1091_v21, %v1646_v43  ;;  %1098 = vrcp.f32 %v901_v39  ;;  %v1093_v13 = vpop.eup %1092  ;;  %v483_v60 = vadd.f32 %v482_v27, %v466_v29 }
 0x2d6   :  { %1100 = vrcp.f32 %v918_v20  ;;  %v1095_v45 = vpop.eup %1094  ;;  %v886_v37 = vmul.f32 %v1093_v13, %v1631_v61 }
 0x2d7   :  { %v853_v31 = vadd.f32 %v852_v63, %v836_v7  ;;  %1102 = vrcp.f32 %v531_v59  ;;  %v1097_v33 = vpop.eup %1096  ;;  %v499_v36 = vmul.f32 %v1095_v45, %v1633_v42 }
 0x2d8   :  { %v516_v38 = vmul.f32 %v1097_v33, %v1602_v58 }
 0x2d9   :  { %v870_v47 = vadd.f32 %v869_v28, %v853_v31  ;;  %v500_v44 = vadd.f32 %v499_v36, %v483_v60 }
 0x2da   :  { %v935_v23 = vpop.xlane.xlu2 %934 }
 0x2db   :  { %1104 = vrcp.f32 %v935_v23  ;;  %v1099_v41 = vpop.eup %1098  ;;  %v887_v46 = vadd.f32 %v886_v37, %v870_v47  ;;  %v517_v24 = vadd.f32 %v516_v38, %v500_v44 }
 0x2dc   :  { %v1101_v43 = vpop.eup %1100  ;;  %v903_v14 = vmul.f32 %v1099_v41, %v1656_v50  ;;  %v548_v30 = vpop.xlane.xlu1 %547 }
 0x2dd   :  { %1106 = vrcp.f32 %v548_v30  ;;  %v1103_v2 = vpop.eup %1102  ;;  %v920_v48 = vmul.f32 %v1101_v43, %v1642_v34 }
 0x2de   :  { %v904_v1 = vadd.f32 %v903_v14, %v887_v46  ;;  %v533_v54 = vmul.f32 %v1103_v2, %v1610_v52 }
 0x2e0   :  { %v921_v61 = vadd.f32 %v920_v48, %v904_v1  ;;  %v534_v56 = vadd.f32 %v533_v54, %v517_v24 }
 0x2e1   :  { %v1105_v6 = vpop.eup %1104 }
 0x2e2   :  { %v937_v42 = vmul.f32 %v1105_v6, %v1660_v51 }
 0x2e3   :  { %v1107_v32 = vpop.eup %1106 }
 0x2e4   :  { %v938_v55 = vadd.f32 %v937_v42, %v921_v61  ;;  %v550_v50 = vmul.f32 %v1107_v32, %v1662_v53 }
 0x2e6   :  { %v939_v57 = vmul.f32 0.125, %v938_v55  ;;  %v551_v58 = vadd.f32 %v550_v50, %v534_v56 }
 0x2e8   :  { %941 = vst [vmem:[#allocation5 + $0x4] sm:$0xf] %v939_v57  ;;  %v552_v34 = vmul.f32 0.125, %v551_v58 }
 0x2ea   :  { %553 = vst [vmem:[#allocation5] sm:$0xf] %v552_v34 }
 0x2eb   :  { %954 = dma.vmem_to_hbm [thread:$0]  %s947_s15, 128, %s949_s16, [#allocation4], %s1162_s11, %s1162_s11, %s1166_s17  }
 0x2ec   :  { %1158 = dma.done.wait [#allocation4], 128  }
 0x2ed   :  { %1159 = vsyncadd [#allocation4], 4294967168 }
 0x2ee   :  { %959 = vsyncpa [#allocation3], 1 }
 0x2ef   :  { %960 = vsyncpa [#allocation4], 1 }

</bundles_post_ra>
